<compile_context>
chip_gen: v6e
topology: v6e:2x2x1
jax: 0.10.0
libtpu: 0.0.40
codegen_flags: <defaults>
</compile_context>

<pallas_src>
import jax
import jax.numpy as jnp
from jax import lax
from jax.experimental import pallas as pl
from jax.experimental.pallas import tpu as pltpu


def _make_stack_kernel(H, W, C, L, num_cells):
    """Kernel closure over static spatial/channel sizes.

    L = batches_per_block * H * W  (folded lane axis).
    """

    def kernel(x_ref, wx_ref, bx_ref, w2_ref, mask_ref, o_ref, patches_ref):
        # One grid step = one batch block; all cells run here (weights are
        # fully resident in VMEM, activation is carried as a value).
        act = x_ref[0].astype(jnp.float32)          # (C, L), channel-major

        for cell in range(num_cells):               # static unroll over cells
            # fused [input_out_1x1 ; folded node1-chain+node2_1x1] matmul
            fused = jnp.dot(wx_ref[cell], act,
                            preferred_element_type=jnp.float32) + bx_ref[cell]
            residual = fused[:C]                    # input_out_1x1(x)
            s = fused[C:]                           # input to the 3x3 conv

            # 3x3 SAME conv as one (C,9C)@(9C,L) matmul. Taps built with lane
            # rolls (XLU) + precomputed boundary masks (also zero cross-image
            # leakage for the folded batch), written into the im2col scratch.
            for kh in range(3):
                for kw in range(3):
                    t = kh * 3 + kw
                    dh, dw = kh - 1, kw - 1
                    d = dh * W + dw
                    shifted = s if d == 0 else pltpu.roll(
                        s, shift=(-d) % L, axis=1)
                    patches_ref[pl.ds(t * C, C), :] = shifted * mask_ref[t]

            out2 = jnp.dot(w2_ref[cell], patches_ref[...],
                           preferred_element_type=jnp.float32)   # (C, L)
            act = residual + out2                   # carry to next cell

        o_ref[0] = act.astype(o_ref.dtype)

    return kernel


def _make_tap_masks(H, W, batches_per_block):
    """(9, 1, L) validity masks for the 9 taps of a SAME 3x3 conv, replicated
    over the batch images folded into the lane axis."""
    HW = H * W
    L = batches_per_block * HW
    pos = jnp.arange(L)
    hw = pos % HW
    h = hw // W
    w = hw % W
    taps = []
    for kh in range(3):
        for kw in range(3):
            dh, dw = kh - 1, kw - 1
            valid = ((h + dh >= 0) & (h + dh < H) &
                     (w + dw >= 0) & (w + dw < W))
            taps.append(valid.astype(jnp.float32))
    return jnp.stack(taps).reshape(9, 1, L)


def stack_forward(x_nchw, packed_params):
    """Runs the whole cell stack in a single pallas_call.

    x_nchw: (N, C, H, W)  (PyTorch layout)
    packed_params: (wx_all, bx_all, w2_all) stacked over cells (see
    pack_stack_params).
    """
    wx_all, bx_all, w2_all = packed_params
    N, C, H, W = x_nchw.shape
    HW = H * W
    num_cells = wx_all.shape[0]

    # Fold batch into the lane axis. Keep a size-2 "parallel" grid axis when
    # N is even so v7x's two TensorCores both get work; otherwise one block
    # per batch element.
    if N % 2 == 0 and N >= 2:
        num_blocks = 2
    else:
        num_blocks = N
    bpb = N // num_blocks                    # batches folded per grid step
    L = bpb * HW

    x = (x_nchw.reshape(num_blocks, bpb, C, HW)
         .transpose(0, 2, 1, 3)
         .reshape(num_blocks, C, L))
    masks = _make_tap_masks(H, W, bpb)       # (9, 1, L)

    out = pl.pallas_call(
        _make_stack_kernel(H, W, C, L, num_cells),
        out_shape=jax.ShapeDtypeStruct((num_blocks, C, L), x_nchw.dtype),
        grid_spec=pltpu.PrefetchScalarGridSpec(
            num_scalar_prefetch=0,
            grid=(num_blocks,),
            in_specs=[
                pl.BlockSpec((1, C, L), lambda b: (b, 0, 0)),             # x block
                pl.BlockSpec((num_cells, 2 * C, C), lambda b: (0, 0, 0)),  # fused 1x1 W (all cells)
                pl.BlockSpec((num_cells, 2 * C, 1), lambda b: (0, 0, 0)),  # fused 1x1 b (all cells)
                pl.BlockSpec((num_cells, C, 9 * C), lambda b: (0, 0, 0)),  # 3x3 W im2col (all cells)
                pl.BlockSpec((9, 1, L), lambda b: (0, 0, 0)),              # tap masks
            ],
            out_specs=pl.BlockSpec((1, C, L), lambda b: (b, 0, 0)),
            scratch_shapes=[pltpu.VMEM((9 * C, L), jnp.float32)],          # im2col buffer
        ),
        compiler_params=pltpu.CompilerParams(
            dimension_semantics=("parallel",)),
    )(x, wx_all, bx_all, w2_all, masks)

    return (out.reshape(num_blocks, C, bpb, HW)
            .transpose(0, 2, 1, 3)
            .reshape(N, C, H, W))


# ---------------- parameter construction / packing ---------------------------
def init_cell_params(key, c, dtype=jnp.float32):
    """Deterministic synthetic parameters for one `cell` (PyTorch layouts)."""
    ks = jax.random.split(key, 8)
    s = 0.1
    w_res = jax.random.normal(ks[0], (c, c), dtype) * s       # input_out_1x1 (Cout,Cin)
    b_res = jax.random.normal(ks[1], (c,), dtype) * s
    w_n1a = jax.random.normal(ks[2], (c, c), dtype) * s       # node1_1x1
    b_n1a = jax.random.normal(ks[3], (c,), dtype) * s
    w_n1 = jax.random.normal(ks[4], (c, c), dtype) * s        # node1 (conv1x1, no bias)
    w_n2a = jax.random.normal(ks[5], (c, c), dtype) * s       # node2_1x1
    b_n2a = jax.random.normal(ks[6], (c,), dtype) * s
    w_n2 = jax.random.normal(ks[7], (c, c, 3, 3), dtype) * s  # node2 (conv3x3, no bias), OIHW
    return (w_res, b_res, w_n1a, b_n1a, w_n1, w_n2a, b_n2a, w_n2)


def pack_stack_params(all_params):
    """Stack per-cell params, fold the node1 chain host-side, and arrange for
    the channel-major kernel."""
    wx, bx, w2 = [], [], []
    for (w_res, b_res, w_n1a, b_n1a, w_n1, w_n2a, b_n2a, w_n2) in all_params:
        c = w_res.shape[0]
        # s = (wn1 @ w_n1a + w_n2a) @ x + (wn1 @ b_n1a + b_n2a)
        w_s = w_n1 @ w_n1a + w_n2a                                   # (C, C)
        b_s = w_n1 @ b_n1a + b_n2a                                   # (C,)
        wx.append(jnp.concatenate([w_res, w_s], axis=0))             # (2C, C)
        bx.append(jnp.concatenate([b_res, b_s], axis=0)[:, None])    # (2C, 1)
        # OIHW -> (Cout, KH, KW, Cin) -> (Cout, 9*Cin), matching tap order kh*3+kw
        w2.append(jnp.transpose(w_n2, (0, 2, 3, 1)).reshape(c, 9 * c))  # (C, 9C)
    return (jnp.stack(wx), jnp.stack(bx), jnp.stack(w2))


# ---------------- pure-JAX reference (correctness check only) ----------------
def _cell_ref_nchw(x, p):
    w_res, b_res, w_n1a, b_n1a, w_n1, w_n2a, b_n2a, w_n2 = p

    def c1(inp, w, b=None):
        y = jnp.einsum('nchw,dc->ndhw', inp, w,
                       precision=lax.Precision.HIGHEST)
        return y if b is None else y + b.reshape(1, -1, 1, 1)

    residual = c1(x, w_res, b_res)
    out1 = c1(c1(x, w_n1a, b_n1a), w_n1)
    s = out1 + c1(x, w_n2a, b_n2a)
    out2 = lax.conv_general_dilated(
        s, w_n2, window_strides=(1, 1), padding='SAME',
        dimension_numbers=('NCHW', 'OIHW', 'NCHW'),
        precision=lax.Precision.HIGHEST)
    return residual + out2


if __name__ == "__main__":
    key = jax.random.PRNGKey(0)
    N, C, H, W = 2, 8, 16, 16    # small NCHW input consistent with the module
    num_cells = 3

    kx, kp = jax.random.split(key)
    x = jax.random.normal(kx, (N, C, H, W), jnp.float32)
    all_params = [init_cell_params(k, C)
                  for k in jax.random.split(kp, num_cells)]
    packed = pack_stack_params(all_params)

    out = jax.block_until_ready(stack_forward(x, packed))
    assert out.shape == (N, C, H, W)

    # reference check
    ref = x
    for p in all_params:
        ref = _cell_ref_nchw(ref, p)
    max_err = float(jnp.max(jnp.abs(out - ref)))
    assert jnp.allclose(out, ref, atol=2e-4, rtol=2e-4), max_err

    print("KERNEL_OK")
</pallas_src>

<mosaic_0001>
module attributes {stable_mosaic.version = 11 : i64} {
  func.func @kernel(%arg0: i32, %arg1: memref<1x8x256xf32, #tpu.memory_space<vmem>>, %arg2: memref<3x16x8xf32, #tpu.memory_space<vmem>>, %arg3: memref<3x16x1xf32, #tpu.memory_space<vmem>>, %arg4: memref<3x8x72xf32, #tpu.memory_space<vmem>>, %arg5: memref<9x1x256xf32, #tpu.memory_space<vmem>>, %arg6: memref<1x8x256xf32, #tpu.memory_space<vmem>>, %arg7: memref<72x256xf32, #tpu.memory_space<vmem>>) attributes {dimension_semantics = [#tpu.dimension_semantics<parallel>], iteration_bounds = array<i64: 2>, scalar_prefetch = 0 : i64, scratch_operands = 1 : i64, tpu.core_type = #tpu.core_type<tc>, window_params = [{transform_indices = @transform_0, window_bounds = array<i64: 1, 8, 256>}, {pipeline_mode = #tpu.pipeline_mode<synchronous>, transform_indices = @transform_1, window_bounds = array<i64: 3, 16, 8>}, {pipeline_mode = #tpu.pipeline_mode<synchronous>, transform_indices = @transform_2, window_bounds = array<i64: 3, 16, 1>}, {pipeline_mode = #tpu.pipeline_mode<synchronous>, transform_indices = @transform_3, window_bounds = array<i64: 3, 8, 72>}, {pipeline_mode = #tpu.pipeline_mode<synchronous>, transform_indices = @transform_4, window_bounds = array<i64: 9, 1, 256>}, {transform_indices = @transform_5, window_bounds = array<i64: 1, 8, 256>}]} {
    %c0 = arith.constant 0 : index
    %c0_0 = arith.constant 0 : index
    %c0_1 = arith.constant 0 : index
    %0 = vector.load %arg1[%c0, %c0_0, %c0_1] : memref<1x8x256xf32, #tpu.memory_space<vmem>>, vector<1x8x256xf32>
    %1 = vector.shape_cast %0 : vector<1x8x256xf32> to vector<8x256xf32>
    %c0_2 = arith.constant 0 : index
    %c0_3 = arith.constant 0 : index
    %c0_4 = arith.constant 0 : index
    %2 = vector.load %arg2[%c0_2, %c0_3, %c0_4] : memref<3x16x8xf32, #tpu.memory_space<vmem>>, vector<1x16x8xf32>
    %3 = vector.shape_cast %2 : vector<1x16x8xf32> to vector<16x8xf32>
    %cst = arith.constant dense<0.000000e+00> : vector<16x256xf32>
    %4 = tpu.matmul %3, %1, %cst {dimension_numbers = #tpu.dot_dimension_numbers<[1], [0], [0], [1], [0, 0, 1, 1], [], []>} : vector<16x8xf32>, vector<8x256xf32>, vector<16x256xf32> -> vector<16x256xf32>
    %c0_5 = arith.constant 0 : index
    %c0_6 = arith.constant 0 : index
    %c0_7 = arith.constant 0 : index
    %5 = vector.load %arg3[%c0_5, %c0_6, %c0_7] : memref<3x16x1xf32, #tpu.memory_space<vmem>>, vector<1x16x1xf32>
    %6 = vector.shape_cast %5 : vector<1x16x1xf32> to vector<16x1xf32>
    %7 = vector.broadcast %6 : vector<16x1xf32> to vector<16x256xf32>
    %8 = arith.addf %4, %7 : vector<16x256xf32>
    %9 = vector.extract_strided_slice %8 {offsets = [0, 0], sizes = [8, 256], strides = [1, 1]} : vector<16x256xf32> to vector<8x256xf32>
    %10 = vector.extract_strided_slice %8 {offsets = [8, 0], sizes = [8, 256], strides = [1, 1]} : vector<16x256xf32> to vector<8x256xf32>
    %c17_i32 = arith.constant 17 : i32
    %11 = tpu.dynamic_rotate %10 by %c17_i32 dim 1 : vector<8x256xf32>, i32 -> vector<8x256xf32>
    %c0_8 = arith.constant 0 : index
    %c0_9 = arith.constant 0 : index
    %c0_10 = arith.constant 0 : index
    %12 = vector.load %arg5[%c0_8, %c0_9, %c0_10] : memref<9x1x256xf32, #tpu.memory_space<vmem>>, vector<1x1x256xf32>
    %13 = vector.shape_cast %12 : vector<1x1x256xf32> to vector<1x256xf32>
    %14 = vector.broadcast %13 : vector<1x256xf32> to vector<8x256xf32>
    %15 = arith.mulf %11, %14 : vector<8x256xf32>
    %c0_11 = arith.constant 0 : index
    %c0_12 = arith.constant 0 : index
    %16 = vector.load %arg7[%c0_11, %c0_12] : memref<72x256xf32, #tpu.memory_space<vmem>>, vector<8x256xf32>
    tpu.vector_store %arg7[%c0_11, %c0_12], %15 {strides = array<i32>} : memref<72x256xf32, #tpu.memory_space<vmem>>, vector<8x256xf32>,
    %c16_i32 = arith.constant 16 : i32
    %17 = tpu.dynamic_rotate %10 by %c16_i32 dim 1 : vector<8x256xf32>, i32 -> vector<8x256xf32>
    %c1 = arith.constant 1 : index
    %c0_13 = arith.constant 0 : index
    %c0_14 = arith.constant 0 : index
    %18 = vector.load %arg5[%c1, %c0_13, %c0_14] : memref<9x1x256xf32, #tpu.memory_space<vmem>>, vector<1x1x256xf32>
    %19 = vector.shape_cast %18 : vector<1x1x256xf32> to vector<1x256xf32>
    %20 = vector.broadcast %19 : vector<1x256xf32> to vector<8x256xf32>
    %21 = arith.mulf %17, %20 : vector<8x256xf32>
    %c8 = arith.constant 8 : index
    %c0_15 = arith.constant 0 : index
    %22 = vector.load %arg7[%c8, %c0_15] : memref<72x256xf32, #tpu.memory_space<vmem>>, vector<8x256xf32>
    tpu.vector_store %arg7[%c8, %c0_15], %21 {strides = array<i32>} : memref<72x256xf32, #tpu.memory_space<vmem>>, vector<8x256xf32>,
    %c15_i32 = arith.constant 15 : i32
    %23 = tpu.dynamic_rotate %10 by %c15_i32 dim 1 : vector<8x256xf32>, i32 -> vector<8x256xf32>
    %c2 = arith.constant 2 : index
    %c0_16 = arith.constant 0 : index
    %c0_17 = arith.constant 0 : index
    %24 = vector.load %arg5[%c2, %c0_16, %c0_17] : memref<9x1x256xf32, #tpu.memory_space<vmem>>, vector<1x1x256xf32>
    %25 = vector.shape_cast %24 : vector<1x1x256xf32> to vector<1x256xf32>
    %26 = vector.broadcast %25 : vector<1x256xf32> to vector<8x256xf32>
    %27 = arith.mulf %23, %26 : vector<8x256xf32>
    %c16 = arith.constant 16 : index
    %c0_18 = arith.constant 0 : index
    %28 = vector.load %arg7[%c16, %c0_18] : memref<72x256xf32, #tpu.memory_space<vmem>>, vector<8x256xf32>
    tpu.vector_store %arg7[%c16, %c0_18], %27 {strides = array<i32>} : memref<72x256xf32, #tpu.memory_space<vmem>>, vector<8x256xf32>,
    %c1_i32 = arith.constant 1 : i32
    %29 = tpu.dynamic_rotate %10 by %c1_i32 dim 1 : vector<8x256xf32>, i32 -> vector<8x256xf32>
    %c3 = arith.constant 3 : index
    %c0_19 = arith.constant 0 : index
    %c0_20 = arith.constant 0 : index
    %30 = vector.load %arg5[%c3, %c0_19, %c0_20] : memref<9x1x256xf32, #tpu.memory_space<vmem>>, vector<1x1x256xf32>
    %31 = vector.shape_cast %30 : vector<1x1x256xf32> to vector<1x256xf32>
    %32 = vector.broadcast %31 : vector<1x256xf32> to vector<8x256xf32>
    %33 = arith.mulf %29, %32 : vector<8x256xf32>
    %c24 = arith.constant 24 : index
    %c0_21 = arith.constant 0 : index
    %34 = vector.load %arg7[%c24, %c0_21] : memref<72x256xf32, #tpu.memory_space<vmem>>, vector<8x256xf32>
    tpu.vector_store %arg7[%c24, %c0_21], %33 {strides = array<i32>} : memref<72x256xf32, #tpu.memory_space<vmem>>, vector<8x256xf32>,
    %c4 = arith.constant 4 : index
    %c0_22 = arith.constant 0 : index
    %c0_23 = arith.constant 0 : index
    %35 = vector.load %arg5[%c4, %c0_22, %c0_23] : memref<9x1x256xf32, #tpu.memory_space<vmem>>, vector<1x1x256xf32>
    %36 = vector.shape_cast %35 : vector<1x1x256xf32> to vector<1x256xf32>
    %37 = vector.broadcast %36 : vector<1x256xf32> to vector<8x256xf32>
    %38 = arith.mulf %10, %37 : vector<8x256xf32>
    %c32 = arith.constant 32 : index
    %c0_24 = arith.constant 0 : index
    %39 = vector.load %arg7[%c32, %c0_24] : memref<72x256xf32, #tpu.memory_space<vmem>>, vector<8x256xf32>
    tpu.vector_store %arg7[%c32, %c0_24], %38 {strides = array<i32>} : memref<72x256xf32, #tpu.memory_space<vmem>>, vector<8x256xf32>,
    %c255_i32 = arith.constant 255 : i32
    %40 = tpu.dynamic_rotate %10 by %c255_i32 dim 1 : vector<8x256xf32>, i32 -> vector<8x256xf32>
    %c5 = arith.constant 5 : index
    %c0_25 = arith.constant 0 : index
    %c0_26 = arith.constant 0 : index
    %41 = vector.load %arg5[%c5, %c0_25, %c0_26] : memref<9x1x256xf32, #tpu.memory_space<vmem>>, vector<1x1x256xf32>
    %42 = vector.shape_cast %41 : vector<1x1x256xf32> to vector<1x256xf32>
    %43 = vector.broadcast %42 : vector<1x256xf32> to vector<8x256xf32>
    %44 = arith.mulf %40, %43 : vector<8x256xf32>
    %c40 = arith.constant 40 : index
    %c0_27 = arith.constant 0 : index
    %45 = vector.load %arg7[%c40, %c0_27] : memref<72x256xf32, #tpu.memory_space<vmem>>, vector<8x256xf32>
    tpu.vector_store %arg7[%c40, %c0_27], %44 {strides = array<i32>} : memref<72x256xf32, #tpu.memory_space<vmem>>, vector<8x256xf32>,
    %c241_i32 = arith.constant 241 : i32
    %46 = tpu.dynamic_rotate %10 by %c241_i32 dim 1 : vector<8x256xf32>, i32 -> vector<8x256xf32>
    %c6 = arith.constant 6 : index
    %c0_28 = arith.constant 0 : index
    %c0_29 = arith.constant 0 : index
    %47 = vector.load %arg5[%c6, %c0_28, %c0_29] : memref<9x1x256xf32, #tpu.memory_space<vmem>>, vector<1x1x256xf32>
    %48 = vector.shape_cast %47 : vector<1x1x256xf32> to vector<1x256xf32>
    %49 = vector.broadcast %48 : vector<1x256xf32> to vector<8x256xf32>
    %50 = arith.mulf %46, %49 : vector<8x256xf32>
    %c48 = arith.constant 48 : index
    %c0_30 = arith.constant 0 : index
    %51 = vector.load %arg7[%c48, %c0_30] : memref<72x256xf32, #tpu.memory_space<vmem>>, vector<8x256xf32>
    tpu.vector_store %arg7[%c48, %c0_30], %50 {strides = array<i32>} : memref<72x256xf32, #tpu.memory_space<vmem>>, vector<8x256xf32>,
    %c240_i32 = arith.constant 240 : i32
    %52 = tpu.dynamic_rotate %10 by %c240_i32 dim 1 : vector<8x256xf32>, i32 -> vector<8x256xf32>
    %c7 = arith.constant 7 : index
    %c0_31 = arith.constant 0 : index
    %c0_32 = arith.constant 0 : index
    %53 = vector.load %arg5[%c7, %c0_31, %c0_32] : memref<9x1x256xf32, #tpu.memory_space<vmem>>, vector<1x1x256xf32>
    %54 = vector.shape_cast %53 : vector<1x1x256xf32> to vector<1x256xf32>
    %55 = vector.broadcast %54 : vector<1x256xf32> to vector<8x256xf32>
    %56 = arith.mulf %52, %55 : vector<8x256xf32>
    %c56 = arith.constant 56 : index
    %c0_33 = arith.constant 0 : index
    %57 = vector.load %arg7[%c56, %c0_33] : memref<72x256xf32, #tpu.memory_space<vmem>>, vector<8x256xf32>
    tpu.vector_store %arg7[%c56, %c0_33], %56 {strides = array<i32>} : memref<72x256xf32, #tpu.memory_space<vmem>>, vector<8x256xf32>,
    %c239_i32 = arith.constant 239 : i32
    %58 = tpu.dynamic_rotate %10 by %c239_i32 dim 1 : vector<8x256xf32>, i32 -> vector<8x256xf32>
    %c8_34 = arith.constant 8 : index
    %c0_35 = arith.constant 0 : index
    %c0_36 = arith.constant 0 : index
    %59 = vector.load %arg5[%c8_34, %c0_35, %c0_36] : memref<9x1x256xf32, #tpu.memory_space<vmem>>, vector<1x1x256xf32>
    %60 = vector.shape_cast %59 : vector<1x1x256xf32> to vector<1x256xf32>
    %61 = vector.broadcast %60 : vector<1x256xf32> to vector<8x256xf32>
    %62 = arith.mulf %58, %61 : vector<8x256xf32>
    %c64 = arith.constant 64 : index
    %c0_37 = arith.constant 0 : index
    %63 = vector.load %arg7[%c64, %c0_37] : memref<72x256xf32, #tpu.memory_space<vmem>>, vector<8x256xf32>
    tpu.vector_store %arg7[%c64, %c0_37], %62 {strides = array<i32>} : memref<72x256xf32, #tpu.memory_space<vmem>>, vector<8x256xf32>,
    %c0_38 = arith.constant 0 : index
    %c0_39 = arith.constant 0 : index
    %c0_40 = arith.constant 0 : index
    %64 = vector.load %arg4[%c0_38, %c0_39, %c0_40] : memref<3x8x72xf32, #tpu.memory_space<vmem>>, vector<1x8x72xf32>
    %65 = vector.shape_cast %64 : vector<1x8x72xf32> to vector<8x72xf32>
    %c0_41 = arith.constant 0 : index
    %c0_42 = arith.constant 0 : index
    %66 = vector.load %arg7[%c0_41, %c0_42] : memref<72x256xf32, #tpu.memory_space<vmem>>, vector<72x256xf32>
    %cst_43 = arith.constant dense<0.000000e+00> : vector<8x256xf32>
    %67 = tpu.matmul %65, %66, %cst_43 {dimension_numbers = #tpu.dot_dimension_numbers<[1], [0], [0], [1], [0, 0, 1, 1], [], []>} : vector<8x72xf32>, vector<72x256xf32>, vector<8x256xf32> -> vector<8x256xf32>
    %68 = arith.addf %9, %67 : vector<8x256xf32>
    %c1_44 = arith.constant 1 : index
    %c0_45 = arith.constant 0 : index
    %c0_46 = arith.constant 0 : index
    %69 = vector.load %arg2[%c1_44, %c0_45, %c0_46] : memref<3x16x8xf32, #tpu.memory_space<vmem>>, vector<1x16x8xf32>
    %70 = vector.shape_cast %69 : vector<1x16x8xf32> to vector<16x8xf32>
    %cst_47 = arith.constant dense<0.000000e+00> : vector<16x256xf32>
    %71 = tpu.matmul %70, %68, %cst_47 {dimension_numbers = #tpu.dot_dimension_numbers<[1], [0], [0], [1], [0, 0, 1, 1], [], []>} : vector<16x8xf32>, vector<8x256xf32>, vector<16x256xf32> -> vector<16x256xf32>
    %c1_48 = arith.constant 1 : index
    %c0_49 = arith.constant 0 : index
    %c0_50 = arith.constant 0 : index
    %72 = vector.load %arg3[%c1_48, %c0_49, %c0_50] : memref<3x16x1xf32, #tpu.memory_space<vmem>>, vector<1x16x1xf32>
    %73 = vector.shape_cast %72 : vector<1x16x1xf32> to vector<16x1xf32>
    %74 = vector.broadcast %73 : vector<16x1xf32> to vector<16x256xf32>
    %75 = arith.addf %71, %74 : vector<16x256xf32>
    %76 = vector.extract_strided_slice %75 {offsets = [0, 0], sizes = [8, 256], strides = [1, 1]} : vector<16x256xf32> to vector<8x256xf32>
    %77 = vector.extract_strided_slice %75 {offsets = [8, 0], sizes = [8, 256], strides = [1, 1]} : vector<16x256xf32> to vector<8x256xf32>
    %c17_i32_51 = arith.constant 17 : i32
    %78 = tpu.dynamic_rotate %77 by %c17_i32_51 dim 1 : vector<8x256xf32>, i32 -> vector<8x256xf32>
    %c0_52 = arith.constant 0 : index
    %c0_53 = arith.constant 0 : index
    %c0_54 = arith.constant 0 : index
    %79 = vector.load %arg5[%c0_52, %c0_53, %c0_54] : memref<9x1x256xf32, #tpu.memory_space<vmem>>, vector<1x1x256xf32>
    %80 = vector.shape_cast %79 : vector<1x1x256xf32> to vector<1x256xf32>
    %81 = vector.broadcast %80 : vector<1x256xf32> to vector<8x256xf32>
    %82 = arith.mulf %78, %81 : vector<8x256xf32>
    %c0_55 = arith.constant 0 : index
    %c0_56 = arith.constant 0 : index
    %83 = vector.load %arg7[%c0_55, %c0_56] : memref<72x256xf32, #tpu.memory_space<vmem>>, vector<8x256xf32>
    tpu.vector_store %arg7[%c0_55, %c0_56], %82 {strides = array<i32>} : memref<72x256xf32, #tpu.memory_space<vmem>>, vector<8x256xf32>,
    %c16_i32_57 = arith.constant 16 : i32
    %84 = tpu.dynamic_rotate %77 by %c16_i32_57 dim 1 : vector<8x256xf32>, i32 -> vector<8x256xf32>
    %c1_58 = arith.constant 1 : index
    %c0_59 = arith.constant 0 : index
    %c0_60 = arith.constant 0 : index
    %85 = vector.load %arg5[%c1_58, %c0_59, %c0_60] : memref<9x1x256xf32, #tpu.memory_space<vmem>>, vector<1x1x256xf32>
    %86 = vector.shape_cast %85 : vector<1x1x256xf32> to vector<1x256xf32>
    %87 = vector.broadcast %86 : vector<1x256xf32> to vector<8x256xf32>
    %88 = arith.mulf %84, %87 : vector<8x256xf32>
    %c8_61 = arith.constant 8 : index
    %c0_62 = arith.constant 0 : index
    %89 = vector.load %arg7[%c8_61, %c0_62] : memref<72x256xf32, #tpu.memory_space<vmem>>, vector<8x256xf32>
    tpu.vector_store %arg7[%c8_61, %c0_62], %88 {strides = array<i32>} : memref<72x256xf32, #tpu.memory_space<vmem>>, vector<8x256xf32>,
    %c15_i32_63 = arith.constant 15 : i32
    %90 = tpu.dynamic_rotate %77 by %c15_i32_63 dim 1 : vector<8x256xf32>, i32 -> vector<8x256xf32>
    %c2_64 = arith.constant 2 : index
    %c0_65 = arith.constant 0 : index
    %c0_66 = arith.constant 0 : index
    %91 = vector.load %arg5[%c2_64, %c0_65, %c0_66] : memref<9x1x256xf32, #tpu.memory_space<vmem>>, vector<1x1x256xf32>
    %92 = vector.shape_cast %91 : vector<1x1x256xf32> to vector<1x256xf32>
    %93 = vector.broadcast %92 : vector<1x256xf32> to vector<8x256xf32>
    %94 = arith.mulf %90, %93 : vector<8x256xf32>
    %c16_67 = arith.constant 16 : index
    %c0_68 = arith.constant 0 : index
    %95 = vector.load %arg7[%c16_67, %c0_68] : memref<72x256xf32, #tpu.memory_space<vmem>>, vector<8x256xf32>
    tpu.vector_store %arg7[%c16_67, %c0_68], %94 {strides = array<i32>} : memref<72x256xf32, #tpu.memory_space<vmem>>, vector<8x256xf32>,
    %c1_i32_69 = arith.constant 1 : i32
    %96 = tpu.dynamic_rotate %77 by %c1_i32_69 dim 1 : vector<8x256xf32>, i32 -> vector<8x256xf32>
    %c3_70 = arith.constant 3 : index
    %c0_71 = arith.constant 0 : index
    %c0_72 = arith.constant 0 : index
    %97 = vector.load %arg5[%c3_70, %c0_71, %c0_72] : memref<9x1x256xf32, #tpu.memory_space<vmem>>, vector<1x1x256xf32>
    %98 = vector.shape_cast %97 : vector<1x1x256xf32> to vector<1x256xf32>
    %99 = vector.broadcast %98 : vector<1x256xf32> to vector<8x256xf32>
    %100 = arith.mulf %96, %99 : vector<8x256xf32>
    %c24_73 = arith.constant 24 : index
    %c0_74 = arith.constant 0 : index
    %101 = vector.load %arg7[%c24_73, %c0_74] : memref<72x256xf32, #tpu.memory_space<vmem>>, vector<8x256xf32>
    tpu.vector_store %arg7[%c24_73, %c0_74], %100 {strides = array<i32>} : memref<72x256xf32, #tpu.memory_space<vmem>>, vector<8x256xf32>,
    %c4_75 = arith.constant 4 : index
    %c0_76 = arith.constant 0 : index
    %c0_77 = arith.constant 0 : index
    %102 = vector.load %arg5[%c4_75, %c0_76, %c0_77] : memref<9x1x256xf32, #tpu.memory_space<vmem>>, vector<1x1x256xf32>
    %103 = vector.shape_cast %102 : vector<1x1x256xf32> to vector<1x256xf32>
    %104 = vector.broadcast %103 : vector<1x256xf32> to vector<8x256xf32>
    %105 = arith.mulf %77, %104 : vector<8x256xf32>
    %c32_78 = arith.constant 32 : index
    %c0_79 = arith.constant 0 : index
    %106 = vector.load %arg7[%c32_78, %c0_79] : memref<72x256xf32, #tpu.memory_space<vmem>>, vector<8x256xf32>
    tpu.vector_store %arg7[%c32_78, %c0_79], %105 {strides = array<i32>} : memref<72x256xf32, #tpu.memory_space<vmem>>, vector<8x256xf32>,
    %c255_i32_80 = arith.constant 255 : i32
    %107 = tpu.dynamic_rotate %77 by %c255_i32_80 dim 1 : vector<8x256xf32>, i32 -> vector<8x256xf32>
    %c5_81 = arith.constant 5 : index
    %c0_82 = arith.constant 0 : index
    %c0_83 = arith.constant 0 : index
    %108 = vector.load %arg5[%c5_81, %c0_82, %c0_83] : memref<9x1x256xf32, #tpu.memory_space<vmem>>, vector<1x1x256xf32>
    %109 = vector.shape_cast %108 : vector<1x1x256xf32> to vector<1x256xf32>
    %110 = vector.broadcast %109 : vector<1x256xf32> to vector<8x256xf32>
    %111 = arith.mulf %107, %110 : vector<8x256xf32>
    %c40_84 = arith.constant 40 : index
    %c0_85 = arith.constant 0 : index
    %112 = vector.load %arg7[%c40_84, %c0_85] : memref<72x256xf32, #tpu.memory_space<vmem>>, vector<8x256xf32>
    tpu.vector_store %arg7[%c40_84, %c0_85], %111 {strides = array<i32>} : memref<72x256xf32, #tpu.memory_space<vmem>>, vector<8x256xf32>,
    %c241_i32_86 = arith.constant 241 : i32
    %113 = tpu.dynamic_rotate %77 by %c241_i32_86 dim 1 : vector<8x256xf32>, i32 -> vector<8x256xf32>
    %c6_87 = arith.constant 6 : index
    %c0_88 = arith.constant 0 : index
    %c0_89 = arith.constant 0 : index
    %114 = vector.load %arg5[%c6_87, %c0_88, %c0_89] : memref<9x1x256xf32, #tpu.memory_space<vmem>>, vector<1x1x256xf32>
    %115 = vector.shape_cast %114 : vector<1x1x256xf32> to vector<1x256xf32>
    %116 = vector.broadcast %115 : vector<1x256xf32> to vector<8x256xf32>
    %117 = arith.mulf %113, %116 : vector<8x256xf32>
    %c48_90 = arith.constant 48 : index
    %c0_91 = arith.constant 0 : index
    %118 = vector.load %arg7[%c48_90, %c0_91] : memref<72x256xf32, #tpu.memory_space<vmem>>, vector<8x256xf32>
    tpu.vector_store %arg7[%c48_90, %c0_91], %117 {strides = array<i32>} : memref<72x256xf32, #tpu.memory_space<vmem>>, vector<8x256xf32>,
    %c240_i32_92 = arith.constant 240 : i32
    %119 = tpu.dynamic_rotate %77 by %c240_i32_92 dim 1 : vector<8x256xf32>, i32 -> vector<8x256xf32>
    %c7_93 = arith.constant 7 : index
    %c0_94 = arith.constant 0 : index
    %c0_95 = arith.constant 0 : index
    %120 = vector.load %arg5[%c7_93, %c0_94, %c0_95] : memref<9x1x256xf32, #tpu.memory_space<vmem>>, vector<1x1x256xf32>
    %121 = vector.shape_cast %120 : vector<1x1x256xf32> to vector<1x256xf32>
    %122 = vector.broadcast %121 : vector<1x256xf32> to vector<8x256xf32>
    %123 = arith.mulf %119, %122 : vector<8x256xf32>
    %c56_96 = arith.constant 56 : index
    %c0_97 = arith.constant 0 : index
    %124 = vector.load %arg7[%c56_96, %c0_97] : memref<72x256xf32, #tpu.memory_space<vmem>>, vector<8x256xf32>
    tpu.vector_store %arg7[%c56_96, %c0_97], %123 {strides = array<i32>} : memref<72x256xf32, #tpu.memory_space<vmem>>, vector<8x256xf32>,
    %c239_i32_98 = arith.constant 239 : i32
    %125 = tpu.dynamic_rotate %77 by %c239_i32_98 dim 1 : vector<8x256xf32>, i32 -> vector<8x256xf32>
    %c8_99 = arith.constant 8 : index
    %c0_100 = arith.constant 0 : index
    %c0_101 = arith.constant 0 : index
    %126 = vector.load %arg5[%c8_99, %c0_100, %c0_101] : memref<9x1x256xf32, #tpu.memory_space<vmem>>, vector<1x1x256xf32>
    %127 = vector.shape_cast %126 : vector<1x1x256xf32> to vector<1x256xf32>
    %128 = vector.broadcast %127 : vector<1x256xf32> to vector<8x256xf32>
    %129 = arith.mulf %125, %128 : vector<8x256xf32>
    %c64_102 = arith.constant 64 : index
    %c0_103 = arith.constant 0 : index
    %130 = vector.load %arg7[%c64_102, %c0_103] : memref<72x256xf32, #tpu.memory_space<vmem>>, vector<8x256xf32>
    tpu.vector_store %arg7[%c64_102, %c0_103], %129 {strides = array<i32>} : memref<72x256xf32, #tpu.memory_space<vmem>>, vector<8x256xf32>,
    %c1_104 = arith.constant 1 : index
    %c0_105 = arith.constant 0 : index
    %c0_106 = arith.constant 0 : index
    %131 = vector.load %arg4[%c1_104, %c0_105, %c0_106] : memref<3x8x72xf32, #tpu.memory_space<vmem>>, vector<1x8x72xf32>
    %132 = vector.shape_cast %131 : vector<1x8x72xf32> to vector<8x72xf32>
    %c0_107 = arith.constant 0 : index
    %c0_108 = arith.constant 0 : index
    %133 = vector.load %arg7[%c0_107, %c0_108] : memref<72x256xf32, #tpu.memory_space<vmem>>, vector<72x256xf32>
    %cst_109 = arith.constant dense<0.000000e+00> : vector<8x256xf32>
    %134 = tpu.matmul %132, %133, %cst_109 {dimension_numbers = #tpu.dot_dimension_numbers<[1], [0], [0], [1], [0, 0, 1, 1], [], []>} : vector<8x72xf32>, vector<72x256xf32>, vector<8x256xf32> -> vector<8x256xf32>
    %135 = arith.addf %76, %134 : vector<8x256xf32>
    %c2_110 = arith.constant 2 : index
    %c0_111 = arith.constant 0 : index
    %c0_112 = arith.constant 0 : index
    %136 = vector.load %arg2[%c2_110, %c0_111, %c0_112] : memref<3x16x8xf32, #tpu.memory_space<vmem>>, vector<1x16x8xf32>
    %137 = vector.shape_cast %136 : vector<1x16x8xf32> to vector<16x8xf32>
    %cst_113 = arith.constant dense<0.000000e+00> : vector<16x256xf32>
    %138 = tpu.matmul %137, %135, %cst_113 {dimension_numbers = #tpu.dot_dimension_numbers<[1], [0], [0], [1], [0, 0, 1, 1], [], []>} : vector<16x8xf32>, vector<8x256xf32>, vector<16x256xf32> -> vector<16x256xf32>
    %c2_114 = arith.constant 2 : index
    %c0_115 = arith.constant 0 : index
    %c0_116 = arith.constant 0 : index
    %139 = vector.load %arg3[%c2_114, %c0_115, %c0_116] : memref<3x16x1xf32, #tpu.memory_space<vmem>>, vector<1x16x1xf32>
    %140 = vector.shape_cast %139 : vector<1x16x1xf32> to vector<16x1xf32>
    %141 = vector.broadcast %140 : vector<16x1xf32> to vector<16x256xf32>
    %142 = arith.addf %138, %141 : vector<16x256xf32>
    %143 = vector.extract_strided_slice %142 {offsets = [0, 0], sizes = [8, 256], strides = [1, 1]} : vector<16x256xf32> to vector<8x256xf32>
    %144 = vector.extract_strided_slice %142 {offsets = [8, 0], sizes = [8, 256], strides = [1, 1]} : vector<16x256xf32> to vector<8x256xf32>
    %c17_i32_117 = arith.constant 17 : i32
    %145 = tpu.dynamic_rotate %144 by %c17_i32_117 dim 1 : vector<8x256xf32>, i32 -> vector<8x256xf32>
    %c0_118 = arith.constant 0 : index
    %c0_119 = arith.constant 0 : index
    %c0_120 = arith.constant 0 : index
    %146 = vector.load %arg5[%c0_118, %c0_119, %c0_120] : memref<9x1x256xf32, #tpu.memory_space<vmem>>, vector<1x1x256xf32>
    %147 = vector.shape_cast %146 : vector<1x1x256xf32> to vector<1x256xf32>
    %148 = vector.broadcast %147 : vector<1x256xf32> to vector<8x256xf32>
    %149 = arith.mulf %145, %148 : vector<8x256xf32>
    %c0_121 = arith.constant 0 : index
    %c0_122 = arith.constant 0 : index
    %150 = vector.load %arg7[%c0_121, %c0_122] : memref<72x256xf32, #tpu.memory_space<vmem>>, vector<8x256xf32>
    tpu.vector_store %arg7[%c0_121, %c0_122], %149 {strides = array<i32>} : memref<72x256xf32, #tpu.memory_space<vmem>>, vector<8x256xf32>,
    %c16_i32_123 = arith.constant 16 : i32
    %151 = tpu.dynamic_rotate %144 by %c16_i32_123 dim 1 : vector<8x256xf32>, i32 -> vector<8x256xf32>
    %c1_124 = arith.constant 1 : index
    %c0_125 = arith.constant 0 : index
    %c0_126 = arith.constant 0 : index
    %152 = vector.load %arg5[%c1_124, %c0_125, %c0_126] : memref<9x1x256xf32, #tpu.memory_space<vmem>>, vector<1x1x256xf32>
    %153 = vector.shape_cast %152 : vector<1x1x256xf32> to vector<1x256xf32>
    %154 = vector.broadcast %153 : vector<1x256xf32> to vector<8x256xf32>
    %155 = arith.mulf %151, %154 : vector<8x256xf32>
    %c8_127 = arith.constant 8 : index
    %c0_128 = arith.constant 0 : index
    %156 = vector.load %arg7[%c8_127, %c0_128] : memref<72x256xf32, #tpu.memory_space<vmem>>, vector<8x256xf32>
    tpu.vector_store %arg7[%c8_127, %c0_128], %155 {strides = array<i32>} : memref<72x256xf32, #tpu.memory_space<vmem>>, vector<8x256xf32>,
    %c15_i32_129 = arith.constant 15 : i32
    %157 = tpu.dynamic_rotate %144 by %c15_i32_129 dim 1 : vector<8x256xf32>, i32 -> vector<8x256xf32>
    %c2_130 = arith.constant 2 : index
    %c0_131 = arith.constant 0 : index
    %c0_132 = arith.constant 0 : index
    %158 = vector.load %arg5[%c2_130, %c0_131, %c0_132] : memref<9x1x256xf32, #tpu.memory_space<vmem>>, vector<1x1x256xf32>
    %159 = vector.shape_cast %158 : vector<1x1x256xf32> to vector<1x256xf32>
    %160 = vector.broadcast %159 : vector<1x256xf32> to vector<8x256xf32>
    %161 = arith.mulf %157, %160 : vector<8x256xf32>
    %c16_133 = arith.constant 16 : index
    %c0_134 = arith.constant 0 : index
    %162 = vector.load %arg7[%c16_133, %c0_134] : memref<72x256xf32, #tpu.memory_space<vmem>>, vector<8x256xf32>
    tpu.vector_store %arg7[%c16_133, %c0_134], %161 {strides = array<i32>} : memref<72x256xf32, #tpu.memory_space<vmem>>, vector<8x256xf32>,
    %c1_i32_135 = arith.constant 1 : i32
    %163 = tpu.dynamic_rotate %144 by %c1_i32_135 dim 1 : vector<8x256xf32>, i32 -> vector<8x256xf32>
    %c3_136 = arith.constant 3 : index
    %c0_137 = arith.constant 0 : index
    %c0_138 = arith.constant 0 : index
    %164 = vector.load %arg5[%c3_136, %c0_137, %c0_138] : memref<9x1x256xf32, #tpu.memory_space<vmem>>, vector<1x1x256xf32>
    %165 = vector.shape_cast %164 : vector<1x1x256xf32> to vector<1x256xf32>
    %166 = vector.broadcast %165 : vector<1x256xf32> to vector<8x256xf32>
    %167 = arith.mulf %163, %166 : vector<8x256xf32>
    %c24_139 = arith.constant 24 : index
    %c0_140 = arith.constant 0 : index
    %168 = vector.load %arg7[%c24_139, %c0_140] : memref<72x256xf32, #tpu.memory_space<vmem>>, vector<8x256xf32>
    tpu.vector_store %arg7[%c24_139, %c0_140], %167 {strides = array<i32>} : memref<72x256xf32, #tpu.memory_space<vmem>>, vector<8x256xf32>,
    %c4_141 = arith.constant 4 : index
    %c0_142 = arith.constant 0 : index
    %c0_143 = arith.constant 0 : index
    %169 = vector.load %arg5[%c4_141, %c0_142, %c0_143] : memref<9x1x256xf32, #tpu.memory_space<vmem>>, vector<1x1x256xf32>
    %170 = vector.shape_cast %169 : vector<1x1x256xf32> to vector<1x256xf32>
    %171 = vector.broadcast %170 : vector<1x256xf32> to vector<8x256xf32>
    %172 = arith.mulf %144, %171 : vector<8x256xf32>
    %c32_144 = arith.constant 32 : index
    %c0_145 = arith.constant 0 : index
    %173 = vector.load %arg7[%c32_144, %c0_145] : memref<72x256xf32, #tpu.memory_space<vmem>>, vector<8x256xf32>
    tpu.vector_store %arg7[%c32_144, %c0_145], %172 {strides = array<i32>} : memref<72x256xf32, #tpu.memory_space<vmem>>, vector<8x256xf32>,
    %c255_i32_146 = arith.constant 255 : i32
    %174 = tpu.dynamic_rotate %144 by %c255_i32_146 dim 1 : vector<8x256xf32>, i32 -> vector<8x256xf32>
    %c5_147 = arith.constant 5 : index
    %c0_148 = arith.constant 0 : index
    %c0_149 = arith.constant 0 : index
    %175 = vector.load %arg5[%c5_147, %c0_148, %c0_149] : memref<9x1x256xf32, #tpu.memory_space<vmem>>, vector<1x1x256xf32>
    %176 = vector.shape_cast %175 : vector<1x1x256xf32> to vector<1x256xf32>
    %177 = vector.broadcast %176 : vector<1x256xf32> to vector<8x256xf32>
    %178 = arith.mulf %174, %177 : vector<8x256xf32>
    %c40_150 = arith.constant 40 : index
    %c0_151 = arith.constant 0 : index
    %179 = vector.load %arg7[%c40_150, %c0_151] : memref<72x256xf32, #tpu.memory_space<vmem>>, vector<8x256xf32>
    tpu.vector_store %arg7[%c40_150, %c0_151], %178 {strides = array<i32>} : memref<72x256xf32, #tpu.memory_space<vmem>>, vector<8x256xf32>,
    %c241_i32_152 = arith.constant 241 : i32
    %180 = tpu.dynamic_rotate %144 by %c241_i32_152 dim 1 : vector<8x256xf32>, i32 -> vector<8x256xf32>
    %c6_153 = arith.constant 6 : index
    %c0_154 = arith.constant 0 : index
    %c0_155 = arith.constant 0 : index
    %181 = vector.load %arg5[%c6_153, %c0_154, %c0_155] : memref<9x1x256xf32, #tpu.memory_space<vmem>>, vector<1x1x256xf32>
    %182 = vector.shape_cast %181 : vector<1x1x256xf32> to vector<1x256xf32>
    %183 = vector.broadcast %182 : vector<1x256xf32> to vector<8x256xf32>
    %184 = arith.mulf %180, %183 : vector<8x256xf32>
    %c48_156 = arith.constant 48 : index
    %c0_157 = arith.constant 0 : index
    %185 = vector.load %arg7[%c48_156, %c0_157] : memref<72x256xf32, #tpu.memory_space<vmem>>, vector<8x256xf32>
    tpu.vector_store %arg7[%c48_156, %c0_157], %184 {strides = array<i32>} : memref<72x256xf32, #tpu.memory_space<vmem>>, vector<8x256xf32>,
    %c240_i32_158 = arith.constant 240 : i32
    %186 = tpu.dynamic_rotate %144 by %c240_i32_158 dim 1 : vector<8x256xf32>, i32 -> vector<8x256xf32>
    %c7_159 = arith.constant 7 : index
    %c0_160 = arith.constant 0 : index
    %c0_161 = arith.constant 0 : index
    %187 = vector.load %arg5[%c7_159, %c0_160, %c0_161] : memref<9x1x256xf32, #tpu.memory_space<vmem>>, vector<1x1x256xf32>
    %188 = vector.shape_cast %187 : vector<1x1x256xf32> to vector<1x256xf32>
    %189 = vector.broadcast %188 : vector<1x256xf32> to vector<8x256xf32>
    %190 = arith.mulf %186, %189 : vector<8x256xf32>
    %c56_162 = arith.constant 56 : index
    %c0_163 = arith.constant 0 : index
    %191 = vector.load %arg7[%c56_162, %c0_163] : memref<72x256xf32, #tpu.memory_space<vmem>>, vector<8x256xf32>
    tpu.vector_store %arg7[%c56_162, %c0_163], %190 {strides = array<i32>} : memref<72x256xf32, #tpu.memory_space<vmem>>, vector<8x256xf32>,
    %c239_i32_164 = arith.constant 239 : i32
    %192 = tpu.dynamic_rotate %144 by %c239_i32_164 dim 1 : vector<8x256xf32>, i32 -> vector<8x256xf32>
    %c8_165 = arith.constant 8 : index
    %c0_166 = arith.constant 0 : index
    %c0_167 = arith.constant 0 : index
    %193 = vector.load %arg5[%c8_165, %c0_166, %c0_167] : memref<9x1x256xf32, #tpu.memory_space<vmem>>, vector<1x1x256xf32>
    %194 = vector.shape_cast %193 : vector<1x1x256xf32> to vector<1x256xf32>
    %195 = vector.broadcast %194 : vector<1x256xf32> to vector<8x256xf32>
    %196 = arith.mulf %192, %195 : vector<8x256xf32>
    %c64_168 = arith.constant 64 : index
    %c0_169 = arith.constant 0 : index
    %197 = vector.load %arg7[%c64_168, %c0_169] : memref<72x256xf32, #tpu.memory_space<vmem>>, vector<8x256xf32>
    tpu.vector_store %arg7[%c64_168, %c0_169], %196 {strides = array<i32>} : memref<72x256xf32, #tpu.memory_space<vmem>>, vector<8x256xf32>,
    %c2_170 = arith.constant 2 : index
    %c0_171 = arith.constant 0 : index
    %c0_172 = arith.constant 0 : index
    %198 = vector.load %arg4[%c2_170, %c0_171, %c0_172] : memref<3x8x72xf32, #tpu.memory_space<vmem>>, vector<1x8x72xf32>
    %199 = vector.shape_cast %198 : vector<1x8x72xf32> to vector<8x72xf32>
    %c0_173 = arith.constant 0 : index
    %c0_174 = arith.constant 0 : index
    %200 = vector.load %arg7[%c0_173, %c0_174] : memref<72x256xf32, #tpu.memory_space<vmem>>, vector<72x256xf32>
    %cst_175 = arith.constant dense<0.000000e+00> : vector<8x256xf32>
    %201 = tpu.matmul %199, %200, %cst_175 {dimension_numbers = #tpu.dot_dimension_numbers<[1], [0], [0], [1], [0, 0, 1, 1], [], []>} : vector<8x72xf32>, vector<72x256xf32>, vector<8x256xf32> -> vector<8x256xf32>
    %202 = arith.addf %143, %201 : vector<8x256xf32>
    %c0_176 = arith.constant 0 : index
    %c0_177 = arith.constant 0 : index
    %c0_178 = arith.constant 0 : index
    %203 = vector.load %arg6[%c0_176, %c0_177, %c0_178] : memref<1x8x256xf32, #tpu.memory_space<vmem>>, vector<1x8x256xf32>
    %204 = vector.shape_cast %203 : vector<1x8x256xf32> to vector<8x256xf32>
    %205 = vector.shape_cast %202 : vector<8x256xf32> to vector<1x8x256xf32>
    tpu.vector_store %arg6[%c0_176, %c0_177, %c0_178], %205 {strides = array<i32>} : memref<1x8x256xf32, #tpu.memory_space<vmem>>, vector<1x8x256xf32>,
    return
  }
  func.func @transform_0(%arg0: i32) -> (i32, i32, i32) {
    %c0_i32 = arith.constant 0 : i32
    %c0_i32_0 = arith.constant 0 : i32
    %c0_i32_1 = arith.constant 0 : i32
    return %arg0, %c0_i32, %c0_i32_0 : i32, i32, i32
  }
  func.func @transform_1(%arg0: i32) -> (i32, i32, i32) {
    %c0_i32 = arith.constant 0 : i32
    %c0_i32_0 = arith.constant 0 : i32
    %c0_i32_1 = arith.constant 0 : i32
    %c0_i32_2 = arith.constant 0 : i32
    return %c0_i32, %c0_i32_0, %c0_i32_1 : i32, i32, i32
  }
  func.func @transform_2(%arg0: i32) -> (i32, i32, i32) {
    %c0_i32 = arith.constant 0 : i32
    %c0_i32_0 = arith.constant 0 : i32
    %c0_i32_1 = arith.constant 0 : i32
    %c0_i32_2 = arith.constant 0 : i32
    return %c0_i32, %c0_i32_0, %c0_i32_1 : i32, i32, i32
  }
  func.func @transform_3(%arg0: i32) -> (i32, i32, i32) {
    %c0_i32 = arith.constant 0 : i32
    %c0_i32_0 = arith.constant 0 : i32
    %c0_i32_1 = arith.constant 0 : i32
    %c0_i32_2 = arith.constant 0 : i32
    return %c0_i32, %c0_i32_0, %c0_i32_1 : i32, i32, i32
  }
  func.func @transform_4(%arg0: i32) -> (i32, i32, i32) {
    %c0_i32 = arith.constant 0 : i32
    %c0_i32_0 = arith.constant 0 : i32
    %c0_i32_1 = arith.constant 0 : i32
    %c0_i32_2 = arith.constant 0 : i32
    return %c0_i32, %c0_i32_0, %c0_i32_1 : i32, i32, i32
  }
  func.func @transform_5(%arg0: i32) -> (i32, i32, i32) {
    %c0_i32 = arith.constant 0 : i32
    %c0_i32_0 = arith.constant 0 : i32
    %c0_i32_1 = arith.constant 0 : i32
    return %arg0, %c0_i32, %c0_i32_0 : i32, i32, i32
  }
}

</mosaic_0001>

<bundles_post_ra>
// kernel: tpu_custom_call.1
= control target key start
LH: loop header
LB: loop body
LE: loop exit
PB: predicated region body
PF: predicated region fallthrough
CT: control target
= control target key end

     0   :  { %10 = vsyncpa [#allocation4], 0  ;;  %s2217_s0 = inlined_call_operand.vmem [shape: f32[2,8,256], index: 0, kind: input, shape index: {}]   ;;  %s2218_s1 = inlined_call_operand.vmem [shape: f32[3,16,8], index: 1, kind: input, shape index: {}]   ;;  %s2219_s2 = inlined_call_operand.vmem [shape: f32[3,16,1], index: 2, kind: input, shape index: {}]   ;;  %s2220_s3 = inlined_call_operand.vmem [shape: f32[3,8,72], index: 3, kind: input, shape index: {}]   ;;  %s2221_s4 = inlined_call_operand.vmem [shape: f32[9,1,256], index: 4, kind: input, shape index: {}]   ;;  %s2222_s5 = inlined_call_operand.hbm [shape: f32[2,8,256], index: 5, kind: output, shape index: {}]  }
   0x1   :  { %12 = vsyncpa [#allocation4 + $0x1], 0  ;;  %s1690_s18 = smov 0   ;;  %s1692_s19 = smov 0  }
   0x2   :  { %s1694_s20 = smov 0   ;;  %s1696_s21 = smov 0  }
   0x3 LB: > { %s1711_s22 = sadd.s32 4294967295, %s1647_s21   ;;  %s1479_s23 = sadd.s32 4294967294, %s1647_s21   ;;  %s1647_s21 = sphi %s1696_s21, %s2228_s21   ;;  %s1643_s20 = sphi %s1694_s20, %s2227_s20   ;;  %s1639_s19 = sphi %s1692_s19, %s2226_s19   ;;  %s1635_s18 = sphi %s1690_s18, %s2225_s18  }
   0x4   : > { %s1715_s24 = sadd.s32 1, %s1647_s21   ;;  %s135_s25 = sadd.s32 1, %s1643_s20 }
   0x5   : > { %s132_s26 = ssub.s32 %s1647_s21, %s1715_s24  ;;  %p145_p0 = scmp.ne.s32.totalorder %s1643_s20, %s1639_s19 }
   0x6   : > { %p133_p1 = scmp.eq.s32.totalorder %s132_s26, 0  ;;  %p146_p2 = scmp.eq.s32.totalorder %s1711_s22, 1 }
   0x7   : > { %p151_p3 = scmp.ne.s32.totalorder %s1639_s19, %s1635_s18  ;;  %p152_p4 = scmp.eq.s32.totalorder %s1479_s23, 1 }
   0x8   : > { %s1726_s27 = scalar_select %p133_p1, %s1643_s20, %s135_s25  }
   0x9   : > { %p1728_p5 = por %p146_p2, %p145_p0  ;;  %p1732_p6 = por %p152_p4, %p151_p3 }
   0xa   : > { %p1482_p7 = scmp.ge.s32.totalorder %s1647_s21, 1  ;;  %p190_p8 = scmp.lt.s32.totalorder %s1647_s21, 3 }
   0xc   : > { %p191_p9 = pnand %p1482_p7, %p190_p8 }
   0xd   : > { %p218_p10 = scmp.lt.s32.totalorder (!%p191_p9), %s1711_s22, 1  ;;  %s1651_s16 = smov (!%p191_p9), 112  }
   0xe   : > { %194 = sbr.rel (%p191_p9) target bundleno = 1679 (0x68f), region = 40  ;;  %s1652_s17 = smov (!%p191_p9), 111  }
   0xf   : > { %s1653_s23 = smov (!%p191_p9), 113   ;;  %s1654_s25 = smov (!%p191_p9), 127  }
  0x10   : > { %s1655_s26 = smov (!%p191_p9), 1   ;;  %s1656_s30 = smov (!%p191_p9), 15  }
  0x11   : > { %s1657_s6 = smov (!%p191_p9), 16  }
  0x13   : > { %v1649_v0 = vmov 0.0   ;;  %v1650_v1 = vmov 0   ;;  %v228_v2 = vld [vmem:[%s2219_s2 + $0x8] sm:$0xff]  ;;  %s219_s7 = scalar_select %p218_p10, %s1711_s22, 1  ;;  %v225_v5 = vld [vmem:[%s2218_s1] sm:$0xff]  ;;  %vm239_vm0 = vcmask 64512   ;;  %v327_v18 = vlaneseq }
  0x14   : > { %310 = vmatprep.mubr.f32.mxu0 %v1649_v0  ;;  %1585 = vset.pattern.permute.xlu0 %v1650_v1  ;;  %v226_v6 = vld [vmem:[%s2218_s1 + $0x8] sm:$0xff]  ;;  %v227_v14 = vld [vmem:[%s2219_s2] sm:$0xff]  ;;  %v1500_v15 = vld [vmem:[%s2219_s2 + $0x18] sm:$0xff]  ;;  %vm552_vm9 = vcmask 588800  }
  0x15   : > { %236 = vperm.xlu0 %1585, %v228_v2   ;;  %1586 = vset.pattern.permute.xlu1 %v1650_v1  ;;  %s1534_s8 = sshll.u32 %s219_s7, 4  ;;  %s1658_s7 = smov 17   ;;  %v335_v20 = vshrl.u32 %v327_v18, 7  ;;  %v1804_v22 = vand.u32 127, %v327_v18  ;;  %v1495_v23 = vld [vmem:[%s2221_s4 + $0x10] sm:$0x3] }
  0x16   : > { %620 = vmatprep.mubr.f32.mxu1 %v1649_v0  ;;  %s222_s11 = scalar_lea.vmem %s2217_s0, %s1534_s8  ;;  %v1494_v28 = vld [vmem:[%s2221_s4 + $0xe] sm:$0x3]  ;;  %v1493_v29 = vld [vmem:[%s2221_s4 + $0xc] sm:$0x3]  ;;  %v1492_v39 = vld [vmem:[%s2221_s4 + $0xa] sm:$0x3] }
  0x17   : > { %v224_v3 = vld [vmem:[%s222_s11 + $0x8] sm:$0xff]  ;;  %v223_v4 = vld [vmem:[%s222_s11] sm:$0xff]  ;;  %v1809_v24 = vsub.s32 0, %v335_v20  ;;  %v1811_v25 = vsub.s32 1, %v335_v20  ;;  %vm489_vm1 = vcmp.lt.s32.totalorder %v1804_v22, 112  ;;  %vm513_vm2 = vcmp.lt.s32.totalorder %v1804_v22, 111 }
  0x18   : > { %276 = vmatprep.subr.mxu0 %v224_v3  ;;  %vm465_vm3 = vcmp.lt.s32.totalorder %v1804_v22, 113  ;;  %vm441_vm4 = vcmp.lt.s32.totalorder %v1804_v22, 127  ;;  %v1491_v51 = vld [vmem:[%s2221_s4 + $0x8] sm:$0x3]  ;;  %v1490_v55 = vld [vmem:[%s2221_s4 + $0x6] sm:$0x3] }
  0x19   : > { %277 = vmatpush1.msra.mxu0 %v223_v4  ;;  %v526_v30 = vrot.slane %v1495_v23, %v1811_v25  ;;  %v522_v31 = vrot.slane %v1495_v23, %v1809_v24  ;;  %v498_v32 = vrot.slane %v1494_v28, %v1809_v24  ;;  %v502_v33 = vrot.slane %v1494_v28, %v1811_v25  ;;  %v1489_v60 = vld [vmem:[%s2221_s4 + $0x4] sm:$0x3]  ;;  %s1535_s8 = sshll.u32 %s1711_s22, 8  ;;  %s1659_s22 = smov [#allocation3]  }
  0x1a   : > { %1486 = vmatmul.mubr.msk.f32.vlgmr.msra.gmra.mxu0 %vm239_vm0, %v225_v5  ;;  %v478_v37 = vrot.slane %v1493_v29, %v1811_v25  ;;  %v474_v44 = vrot.slane %v1493_v29, %v1809_v24  ;;  %v454_v48 = vrot.slane %v1492_v39, %v1811_v25  ;;  %v450_v53 = vrot.slane %v1492_v39, %v1809_v24  ;;  %s1418_s13 = scalar_lea.hbm %s2222_s5, %s1535_s8 }
  0x1b   : > { %316 = vmatprep.mubr.f32.mxu0 %v1649_v0  ;;  %vm400_vm5 = vcmp.lt.s32.totalorder %v1804_v22, 1  ;;  %v430_v58 = vrot.slane %v1491_v51, %v1811_v25  ;;  %v426_v61 = vrot.slane %v1491_v51, %v1809_v24  ;;  %v413_v63 = vrot.slane %v1490_v55, %v1811_v25 }
  0x1c   : > { %vm376_vm6 = vcmp.lt.s32.totalorder %v1804_v22, 15  ;;  %v409_v4 = vrot.slane %v1490_v55, %v1809_v24  ;;  %vm352_vm7 = vcmp.lt.s32.totalorder %v1804_v22, 16  ;;  %vm329_vm8 = vcmp.lt.s32.totalorder %v1804_v22, 17  ;;  %v1499_v55 = vld [vmem:[%s2219_s2 + $0x10] sm:$0xff] }
  0x1e   : > { %1487 = vmatmul.mubr.msk.f32.gmra.mxu0 %vm239_vm0, %v226_v6  ;;  %v1488_v6 = vld [vmem:[%s2221_s4 + $0x2] sm:$0x3] }
  0x1f   : > { %715 = vmatprep.mubr.f32.mxu0 %v1649_v0 }
  0x90   : > { %v237_v9 = vpop.permute.xlu0 %236 }
  0xda   : > { %v1758_v7 = vpop.f32.mrf.mxu0 }
  0xdc   : > { %v1760_v8 = vpop.f32.mrf.mxu0 }
  0xde   : > { %v318_v10 = vpop.f32.mrf.mxu0 }
  0xdf   : > { %v1762_v11 = vadd.f32 %v318_v10, %v237_v9  ;;  %v389_v10 = vrot.slane %v1489_v60, %v1811_v25 }
  0xe0   : > { %v320_v12 = vpop.f32.mrf.mxu0 }
  0xe1   : > { %485 = vrot.lane.b32.xlu1 %v1762_v11, %s1651_s16  ;;  %509 = vrot.lane.b32.xlu0 %v1762_v11, %s1652_s17  ;;  %v1768_v13 = vadd.f32 %v320_v12, %v237_v9 }
  0xe3   : > { %v434_v12 = vmul.f32 %v430_v58, %v1768_v13 }
  0xe5   : > { %461 = vrot.lane.b32.xlu1 %v1762_v11, %s1653_s23  ;;  %487 = vrot.lane.b32.xlu0 %v1768_v13, %s1651_s16 }
  0xe9   : > { %437 = vrot.lane.b32.xlu1 %v1762_v11, %s1654_s25  ;;  %463 = vrot.lane.b32.xlu0 %v1768_v13, %s1653_s23 }
  0xed   : > { %511 = vrot.lane.b32.xlu1 %v1768_v13, %s1652_s17  ;;  %439 = vrot.lane.b32.xlu0 %v1768_v13, %s1654_s25 }
  0xf1   : > { %396 = vrot.lane.b32.xlu1 %v1762_v11, %s1655_s26  ;;  %398 = vrot.lane.b32.xlu0 %v1768_v13, %s1655_s26 }
  0xf5   : > { %372 = vrot.lane.b32.xlu1 %v1762_v11, %s1656_s30  ;;  %374 = vrot.lane.b32.xlu0 %v1768_v13, %s1656_s30 }
  0xf9   : > { %348 = vrot.lane.b32.xlu1 %v1762_v11, %s1657_s6  ;;  %350 = vrot.lane.b32.xlu0 %v1768_v13, %s1657_s6 }
  0xfd   : > { %323 = vrot.lane.b32.xlu1 %v1762_v11, %s1658_s7  ;;  %325 = vrot.lane.b32.xlu0 %v1768_v13, %s1658_s7  ;;  %v365_v13 = vrot.slane %v1488_v6, %v1811_v25 }
 0x101   : > { %231 = vperm.xlu1 %1586, %v227_v14   ;;  %642 = vperm.xlu0 %1585, %v1500_v15   ;;  %v385_v14 = vrot.slane %v1489_v60, %v1809_v24 }
 0x153   : > { %v486_v16 = vpop.permute.xlu1 %485  ;;  %v510_v17 = vpop.permute.xlu0 %509 }
 0x157   : > { %v462_v19 = vpop.permute.xlu1 %461  ;;  %v488_v21 = vpop.permute.xlu0 %487 }
 0x158   : > { %v491_v36 = vsel %vm489_vm1, %v488_v21, %v486_v16  ;;  %v490_v41 = vsel %vm489_vm1, %v486_v16, %v488_v21  ;;  %v433_v16 = vmul.f32 %v426_v61, %v1762_v11  ;;  %v1509_v61 = vld [vmem:[%s2221_s4 + $0xe] sm:$0x3] }
 0x159   : > { %v506_v46 = vmul.f32 %v502_v33, %v491_v36  ;;  %v505_v52 = vmul.f32 %v498_v32, %v490_v41 }
 0x15b   : > { %v438_v26 = vpop.permute.xlu1 %437  ;;  %v464_v27 = vpop.permute.xlu0 %463 }
 0x15c   : > { %v467_v45 = vsel %vm465_vm3, %v464_v27, %v462_v19  ;;  %v466_v47 = vsel %vm465_vm3, %v462_v19, %v464_v27 }
 0x15d   : > { %v482_v56 = vmul.f32 %v478_v37, %v467_v45  ;;  %v481_v59 = vmul.f32 %v474_v44, %v466_v47 }
 0x15f   : > { %v512_v34 = vpop.permute.xlu1 %511  ;;  %v440_v35 = vpop.permute.xlu0 %439 }
 0x160   : > { %v514_v38 = vsel %vm513_vm2, %v510_v17, %v512_v34  ;;  %v515_v40 = vsel %vm513_vm2, %v512_v34, %v510_v17  ;;  %v443_v54 = vsel %vm441_vm4, %v440_v35, %v438_v26  ;;  %v442_v57 = vsel %vm441_vm4, %v438_v26, %v440_v35  ;;  %v332_v17 = vld [vmem:[%s2221_s4] sm:$0x3] }
 0x161   : > { %v530_v42 = vmul.f32 %v526_v30, %v515_v40  ;;  %v529_v43 = vmul.f32 %v522_v31, %v514_v38  ;;  %v458_v62 = vmul.f32 %v454_v48, %v443_v54  ;;  %v457_v3 = vmul.f32 %v450_v53, %v442_v57  ;;  %v533_v40 = vld [vmem:[%s2220_s3] sm:$0xff]  ;;  %v1497_v48 = vld [vmem:[%s2218_s1 + $0x10] sm:$0xff] }
 0x162   : > { %v361_v26 = vrot.slane %v1488_v6, %v1809_v24  ;;  %v337_v29 = vrot.slane %v332_v17, %v1809_v24  ;;  %v341_v30 = vrot.slane %v332_v17, %v1811_v25  ;;  %v1510_v57 = vld [vmem:[%s2221_s4 + $0x10] sm:$0x3]  ;;  %v891_v6 = vrot.slane %v1509_v61, %v1811_v25 }
 0x163   : > { %v397_v49 = vpop.permute.xlu1 %396  ;;  %570 = vmatprep.subr.mxu1 %v530_v42  ;;  %v399_v50 = vpop.permute.xlu0 %398  ;;  %v913_v60 = vrot.slane %v1510_v57, %v1811_v25 }
 0x164   : > { %571 = vmatpush1.msra.mxu1 %v529_v43  ;;  %v401_v5 = vsel %vm400_vm5, %v397_v49, %v399_v50  ;;  %v402_v9 = vsel %vm400_vm5, %v399_v50, %v397_v49  ;;  %v1498_v49 = vld [vmem:[%s2218_s1 + $0x18] sm:$0xff] }
 0x165   : > { %572 = vmatprep.subr.mxu1 %v506_v46  ;;  %v417_v18 = vmul.f32 %v413_v63, %v401_v5  ;;  %v416_v23 = vmul.f32 %v409_v4, %v402_v9  ;;  %v887_v5 = vrot.slane %v1509_v61, %v1809_v24  ;;  %v1508_v9 = vld [vmem:[%s2221_s4 + $0xc] sm:$0x3] }
 0x166   : > { %573 = vmatpush1.msra.mxu1 %v505_v52 }
 0x167   : > { %v373_v1 = vpop.permute.xlu1 %372  ;;  %574 = vmatprep.subr.mxu1 %v482_v56  ;;  %v375_v2 = vpop.permute.xlu0 %374  ;;  %v1516_v56 = vld [vmem:[%s2219_s2 + $0x28] sm:$0xff] }
 0x168   : > { %575 = vmatpush1.msra.mxu1 %v481_v59  ;;  %v377_v15 = vsel %vm376_vm6, %v373_v1, %v375_v2  ;;  %v378_v19 = vsel %vm376_vm6, %v375_v2, %v373_v1  ;;  %v909_v59 = vrot.slane %v1510_v57, %v1809_v24 }
 0x169   : > { %576 = vmatprep.subr.mxu1 %v458_v62  ;;  %v393_v11 = vmul.f32 %v389_v10, %v377_v15  ;;  %v392_v31 = vmul.f32 %v385_v14, %v378_v19  ;;  %v869_v19 = vrot.slane %v1508_v9, %v1811_v25 }
 0x16a   : > { %577 = vmatpush1.msra.mxu1 %v457_v3 }
 0x16b   : > { %v349_v20 = vpop.permute.xlu1 %348  ;;  %578 = vmatprep.subr.mxu1 %v434_v12  ;;  %v351_v21 = vpop.permute.xlu0 %350 }
 0x16c   : > { %v353_v27 = vsel %vm352_vm7, %v349_v20, %v351_v21  ;;  %579 = vmatpush1.msra.mxu1 %v433_v16  ;;  %v354_v28 = vsel %vm352_vm7, %v351_v21, %v349_v20  ;;  %v1507_v20 = vld [vmem:[%s2221_s4 + $0xa] sm:$0x3] }
 0x16d   : > { %580 = vmatprep.subr.mxu1 %v417_v18  ;;  %v369_v32 = vmul.f32 %v365_v13, %v353_v27  ;;  %v368_v35 = vmul.f32 %v361_v26, %v354_v28  ;;  %v865_v18 = vrot.slane %v1508_v9, %v1809_v24  ;;  %v843_v28 = vrot.slane %v1507_v20, %v1809_v24 }
 0x16e   : > { %581 = vmatpush1.msra.mxu1 %v416_v23 }
 0x16f   : > { %v324_v33 = vpop.permute.xlu1 %323  ;;  %v326_v34 = vpop.permute.xlu0 %325  ;;  %582 = vmatprep.subr.mxu1 %v393_v11 }
 0x170   : > { %v330_v36 = vsel %vm329_vm8, %v324_v33, %v326_v34  ;;  %v331_v37 = vsel %vm329_vm8, %v326_v34, %v324_v33  ;;  %583 = vmatpush1.msra.mxu1 %v392_v31  ;;  %v1505_v31 = vld [vmem:[%s2221_s4 + $0x6] sm:$0x3] }
 0x171   : > { %v344_v38 = vmul.f32 %v337_v29, %v331_v37  ;;  %v345_v39 = vmul.f32 %v341_v30, %v330_v36  ;;  %584 = vmatprep.subr.mxu1 %v369_v32  ;;  %v847_v29 = vrot.slane %v1507_v20, %v1811_v25  ;;  %v1506_v30 = vld [vmem:[%s2221_s4 + $0x8] sm:$0x3] }
 0x172   : > { %585 = vmatpush1.msra.mxu1 %v368_v35  ;;  %v825_v33 = vrot.slane %v1506_v30, %v1811_v25  ;;  %v821_v36 = vrot.slane %v1506_v30, %v1809_v24 }
 0x173   : > { %586 = vmatprep.subr.mxu1 %v345_v39 }
 0x174   : > { %587 = vmatpush1.msra.mxu1 %v344_v38 }
 0x175   : > { %1496 = vmatmul.mubr.msk.f32.vlgmr.msra.gmra.mxu1 %vm552_vm9, %v533_v40  ;;  %v805_v40 = vrot.slane %v1505_v31, %v1809_v24 }
 0x176   : > { %1394 = vmatprep.mubr.f32.mxu1 %v1649_v0 }
 0x17c   : > { %v232_v41 = vpop.permute.xlu1 %231  ;;  %v643_v50 = vpop.permute.xlu0 %642 }
 0x17d   : > { %v315_v43 = vadd.f32 %v1760_v8, %v232_v41  ;;  %v313_v44 = vadd.f32 %v1758_v7, %v232_v41  ;;  %v809_v41 = vrot.slane %v1505_v31, %v1811_v25 }
 0x235   : > { %v622_v42 = vpop.f32.mrf.mxu1 }
 0x236   : > { %v627_v47 = vadd.f32 %v622_v42, %v313_v44  ;;  %v1504_v42 = vld [vmem:[%s2221_s4 + $0x4] sm:$0x3] }
 0x237   : > { %v624_v45 = vpop.f32.mrf.mxu1 }
 0x238   : > { %v628_v46 = vadd.f32 %v624_v45, %v315_v43 }
 0x23a   : > { %681 = vmatprep.subr.mxu0 %v628_v46 }
 0x23b   : > { %682 = vmatpush1.msra.mxu0 %v627_v47 }
 0x23c   : > { %1501 = vmatmul.mubr.msk.f32.vlgmr.msra.gmra.mxu0 %vm239_vm0, %v1497_v48 }
 0x23d   : > { %721 = vmatprep.mubr.f32.mxu0 %v1649_v0 }
 0x240   : > { %1502 = vmatmul.mubr.msk.f32.gmra.mxu0 %vm239_vm0, %v1498_v49 }
 0x241   : > { %1007 = vmatprep.mubr.f32.mxu0 %v1649_v0 }
 0x2fc   : > { %v1914_v7 = vpop.f32.mrf.mxu0 }
 0x2fe   : > { %v1916_v8 = vpop.f32.mrf.mxu0 }
 0x300   : > { %v723_v51 = vpop.f32.mrf.mxu0 }
 0x301   : > { %v1918_v52 = vadd.f32 %v723_v51, %v643_v50  ;;  %v783_v51 = vrot.slane %v1504_v42, %v1809_v24 }
 0x302   : > { %v725_v53 = vpop.f32.mrf.mxu0 }
 0x303   : > { %v1920_v54 = vadd.f32 %v725_v53, %v643_v50  ;;  %898 = vrot.lane.b32.xlu1 %v1918_v52, %s1652_s17  ;;  %v828_v47 = vmul.f32 %v821_v36, %v1918_v52  ;;  %v787_v53 = vrot.slane %v1504_v42, %v1811_v25 }
 0x305   : > { %900 = vrot.lane.b32.xlu0 %v1920_v54, %s1652_s17  ;;  %v829_v44 = vmul.f32 %v825_v33, %v1920_v54  ;;  %v1526_v33 = vld [vmem:[%s2221_s4 + $0x10] sm:$0x3] }
 0x306   : > { %v1300_v36 = vrot.slane %v1526_v33, %v1811_v25 }
 0x307   : > { %876 = vrot.lane.b32.xlu1 %v1918_v52, %s1651_s16 }
 0x309   : > { %878 = vrot.lane.b32.xlu0 %v1920_v54, %s1651_s16 }
 0x30b   : > { %854 = vrot.lane.b32.xlu1 %v1918_v52, %s1653_s23 }
 0x30d   : > { %856 = vrot.lane.b32.xlu0 %v1920_v54, %s1653_s23 }
 0x30f   : > { %832 = vrot.lane.b32.xlu1 %v1918_v52, %s1654_s25 }
 0x311   : > { %834 = vrot.lane.b32.xlu0 %v1920_v54, %s1654_s25 }
 0x313   : > { %794 = vrot.lane.b32.xlu1 %v1918_v52, %s1655_s26 }
 0x315   : > { %796 = vrot.lane.b32.xlu0 %v1920_v54, %s1655_s26 }
 0x317   : > { %772 = vrot.lane.b32.xlu1 %v1918_v52, %s1656_s30 }
 0x319   : > { %774 = vrot.lane.b32.xlu0 %v1920_v54, %s1656_s30 }
 0x31b   : > { %750 = vrot.lane.b32.xlu1 %v1918_v52, %s1657_s6 }
 0x31d   : > { %752 = vrot.lane.b32.xlu0 %v1920_v54, %s1657_s6 }
 0x31f   : > { %728 = vrot.lane.b32.xlu1 %v1918_v52, %s1658_s7 }
 0x321   : > { %730 = vrot.lane.b32.xlu0 %v1920_v54, %s1658_s7  ;;  %v1503_v54 = vld [vmem:[%s2221_s4 + $0x2] sm:$0x3] }
 0x322   : > { %v765_v61 = vrot.slane %v1503_v54, %v1811_v25 }
 0x323   : > { %637 = vperm.xlu1 %1586, %v1499_v55  }
 0x325   : > { %1029 = vperm.xlu0 %1585, %v1516_v56  }
 0x375   : > { %v899_v58 = vpop.permute.xlu1 %898 }
 0x377   : > { %v901_v62 = vpop.permute.xlu0 %900 }
 0x378   : > { %v902_v63 = vsel %vm513_vm2, %v899_v58, %v901_v62  ;;  %v903_v1 = vsel %vm513_vm2, %v901_v62, %v899_v58  ;;  %v734_v62 = vld [vmem:[%s2221_s4] sm:$0x3] }
 0x379   : > { %v916_v2 = vmul.f32 %v909_v59, %v902_v63  ;;  %v917_v3 = vmul.f32 %v913_v60, %v903_v1  ;;  %v877_v4 = vpop.permute.xlu1 %876  ;;  %v761_v60 = vrot.slane %v1503_v54, %v1809_v24 }
 0x37b   : > { %v879_v10 = vpop.permute.xlu0 %878  ;;  %957 = vmatprep.subr.mxu0 %v917_v3 }
 0x37c   : > { %v880_v12 = vsel %vm489_vm1, %v877_v4, %v879_v10  ;;  %v881_v14 = vsel %vm489_vm1, %v879_v10, %v877_v4  ;;  %958 = vmatpush1.msra.mxu0 %v916_v2 }
 0x37d   : > { %v894_v15 = vmul.f32 %v887_v5, %v880_v12  ;;  %v895_v16 = vmul.f32 %v891_v6, %v881_v14  ;;  %v855_v17 = vpop.permute.xlu1 %854  ;;  %v739_v5 = vrot.slane %v734_v62, %v1809_v24  ;;  %v743_v6 = vrot.slane %v734_v62, %v1811_v25 }
 0x37f   : > { %v857_v13 = vpop.permute.xlu0 %856  ;;  %959 = vmatprep.subr.mxu0 %v895_v16 }
 0x380   : > { %v858_v21 = vsel %vm465_vm3, %v855_v17, %v857_v13  ;;  %v859_v23 = vsel %vm465_vm3, %v857_v13, %v855_v17  ;;  %960 = vmatpush1.msra.mxu0 %v894_v15  ;;  %v1511_v17 = vld [vmem:[%s2220_s3 + $0x8] sm:$0xff] }
 0x381   : > { %v872_v26 = vmul.f32 %v865_v18, %v858_v21  ;;  %v873_v27 = vmul.f32 %v869_v19, %v859_v23  ;;  %v833_v11 = vpop.permute.xlu1 %832 }
 0x383   : > { %v835_v32 = vpop.permute.xlu0 %834  ;;  %961 = vmatprep.subr.mxu0 %v873_v27  ;;  %v1513_v27 = vld [vmem:[%s2218_s1 + $0x20] sm:$0xff] }
 0x384   : > { %v836_v34 = vsel %vm441_vm4, %v833_v11, %v835_v32  ;;  %v837_v35 = vsel %vm441_vm4, %v835_v32, %v833_v11  ;;  %962 = vmatpush1.msra.mxu0 %v872_v26  ;;  %v1514_v11 = vld [vmem:[%s2218_s1 + $0x28] sm:$0xff] }
 0x385   : > { %v850_v37 = vmul.f32 %v843_v28, %v836_v34  ;;  %v851_v38 = vmul.f32 %v847_v29, %v837_v35  ;;  %v795_v39 = vpop.permute.xlu1 %794  ;;  %v1296_v35 = vrot.slane %v1526_v33, %v1809_v24 }
 0x387   : > { %v797_v43 = vpop.permute.xlu0 %796  ;;  %963 = vmatprep.subr.mxu0 %v851_v38 }
 0x388   : > { %v798_v45 = vsel %vm400_vm5, %v795_v39, %v797_v43  ;;  %v799_v46 = vsel %vm400_vm5, %v797_v43, %v795_v39  ;;  %964 = vmatpush1.msra.mxu0 %v850_v37  ;;  %v1525_v37 = vld [vmem:[%s2221_s4 + $0xe] sm:$0x3] }
 0x389   : > { %v812_v48 = vmul.f32 %v805_v40, %v799_v46  ;;  %v813_v49 = vmul.f32 %v809_v41, %v798_v45  ;;  %965 = vmatprep.subr.mxu0 %v829_v44  ;;  %v773_v50 = vpop.permute.xlu1 %772  ;;  %v1274_v44 = vrot.slane %v1525_v37, %v1809_v24  ;;  %v1278_v45 = vrot.slane %v1525_v37, %v1811_v25  ;;  %v1524_v46 = vld [vmem:[%s2221_s4 + $0xc] sm:$0x3]  ;;  %v1121_v37 = vld [vmem:[%s2221_s4] sm:$0x3] }
 0x38a   : > { %966 = vmatpush1.msra.mxu0 %v828_v47  ;;  %v1252_v54 = vrot.slane %v1524_v46, %v1809_v24 }
 0x38b   : > { %v775_v55 = vpop.permute.xlu0 %774  ;;  %967 = vmatprep.subr.mxu0 %v813_v49 }
 0x38c   : > { %v776_v56 = vsel %vm376_vm6, %v773_v50, %v775_v55  ;;  %v777_v52 = vsel %vm376_vm6, %v775_v55, %v773_v50  ;;  %968 = vmatpush1.msra.mxu0 %v812_v48  ;;  %v1256_v55 = vrot.slane %v1524_v46, %v1811_v25 }
 0x38d   : > { %v790_v57 = vmul.f32 %v783_v51, %v777_v52  ;;  %v791_v58 = vmul.f32 %v787_v53, %v776_v56  ;;  %v751_v59 = vpop.permute.xlu1 %750  ;;  %v1523_v56 = vld [vmem:[%s2221_s4 + $0xa] sm:$0x3] }
 0x38e   : > { %v1230_v62 = vrot.slane %v1523_v56, %v1809_v24 }
 0x38f   : > { %v753_v63 = vpop.permute.xlu0 %752  ;;  %969 = vmatprep.subr.mxu0 %v791_v58 }
 0x390   : > { %v754_v1 = vsel %vm352_vm7, %v751_v59, %v753_v63  ;;  %v755_v2 = vsel %vm352_vm7, %v753_v63, %v751_v59  ;;  %970 = vmatpush1.msra.mxu0 %v790_v57  ;;  %v1234_v63 = vrot.slane %v1523_v56, %v1811_v25 }
 0x391   : > { %v768_v3 = vmul.f32 %v761_v60, %v755_v2  ;;  %v769_v4 = vmul.f32 %v765_v61, %v754_v1  ;;  %v729_v9 = vpop.permute.xlu1 %728  ;;  %v1522_v1 = vld [vmem:[%s2221_s4 + $0x8] sm:$0x3]  ;;  %v1521_v2 = vld [vmem:[%s2221_s4 + $0x6] sm:$0x3] }
 0x393   : > { %v731_v10 = vpop.permute.xlu0 %730  ;;  %971 = vmatprep.subr.mxu0 %v769_v4  ;;  %v1212_v4 = vrot.slane %v1522_v1, %v1811_v25 }
 0x394   : > { %v732_v12 = vsel %vm329_vm8, %v729_v9, %v731_v10  ;;  %v733_v14 = vsel %vm329_vm8, %v731_v10, %v729_v9  ;;  %972 = vmatpush1.msra.mxu0 %v768_v3  ;;  %v1208_v9 = vrot.slane %v1522_v1, %v1809_v24 }
 0x395   : > { %v746_v15 = vmul.f32 %v739_v5, %v733_v14  ;;  %v747_v16 = vmul.f32 %v743_v6, %v732_v12 }
 0x397   : > { %973 = vmatprep.subr.mxu0 %v747_v16  ;;  %v1196_v16 = vrot.slane %v1521_v2, %v1811_v25 }
 0x398   : > { %974 = vmatpush1.msra.mxu0 %v746_v15  ;;  %v1192_v15 = vrot.slane %v1521_v2, %v1809_v24 }
 0x399   : > { %1512 = vmatmul.mubr.msk.f32.vlgmr.msra.gmra.mxu0 %vm552_vm9, %v1511_v17  ;;  %v1520_v17 = vld [vmem:[%s2221_s4 + $0x4] sm:$0x3] }
 0x39a   : > { %1102 = vmatprep.mubr.f32.mxu0 %v1649_v0 }
 0x39e   : > { %v638_v18 = vpop.permute.xlu1 %637 }
 0x39f   : > { %v720_v20 = vadd.f32 %v1916_v8, %v638_v18  ;;  %v718_v13 = vadd.f32 %v1914_v7, %v638_v18 }
 0x3a0   : > { %v1030_v28 = vpop.permute.xlu0 %1029 }
 0x459   : > { %v1009_v19 = vpop.f32.mrf.mxu0 }
 0x45a   : > { %v1014_v26 = vadd.f32 %v1009_v19, %v718_v13 }
 0x45b   : > { %v1011_v21 = vpop.f32.mrf.mxu0 }
 0x45c   : > { %v1015_v23 = vadd.f32 %v1011_v21, %v720_v20 }
 0x45e   : > { %1068 = vmatprep.subr.mxu0 %v1015_v23 }
 0x45f   : > { %1069 = vmatpush1.msra.mxu0 %v1014_v26 }
 0x460   : > { %1517 = vmatmul.mubr.msk.f32.vlgmr.msra.gmra.mxu0 %vm239_vm0, %v1513_v27 }
 0x461   : > { %1108 = vmatprep.mubr.f32.mxu0 %v1649_v0  ;;  %v1515_v0 = vld [vmem:[%s2219_s2 + $0x20] sm:$0xff] }
 0x464   : > { %1518 = vmatmul.mubr.msk.f32.gmra.mxu0 %vm239_vm0, %v1514_v11  ;;  %v1170_v11 = vrot.slane %v1520_v17, %v1809_v24 }
 0x520   : > { %v2055_v7 = vpop.f32.mrf.mxu0 }
 0x522   : > { %v2057_v8 = vpop.f32.mrf.mxu0 }
 0x524   : > { %v1110_v29 = vpop.f32.mrf.mxu0 }
 0x525   : > { %v2059_v30 = vadd.f32 %v1110_v29, %v1030_v28  ;;  %v1519_v29 = vld [vmem:[%s2221_s4 + $0x2] sm:$0x3] }
 0x526   : > { %v1112_v31 = vpop.f32.mrf.mxu0 }
 0x527   : > { %v2061_v32 = vadd.f32 %v1112_v31, %v1030_v28  ;;  %1285 = vrot.lane.b32.xlu1 %v2059_v30, %s1652_s17  ;;  %v1215_v21 = vmul.f32 %v1208_v9, %v2059_v30  ;;  %v1174_v28 = vrot.slane %v1520_v17, %v1811_v25 }
 0x529   : > { %1287 = vrot.lane.b32.xlu0 %v2061_v32, %s1652_s17  ;;  %v1216_v19 = vmul.f32 %v1212_v4, %v2061_v32 }
 0x52b   : > { %1263 = vrot.lane.b32.xlu1 %v2059_v30, %s1651_s16 }
 0x52d   : > { %1265 = vrot.lane.b32.xlu0 %v2061_v32, %s1651_s16  ;;  %s1591_s16 = sshll.u32 %s1659_s22, 4  ;;  %s1592_s16 = int_to_ptr.vmem [resolvable:$false] %s1591_s16 }
 0x52e   : > { %s1593_s17 = scalar_lea.vmem %s1592_s16, 512 }
 0x52f   : > { %1241 = vrot.lane.b32.xlu1 %v2059_v30, %s1653_s23 }
 0x531   : > { %1243 = vrot.lane.b32.xlu0 %v2061_v32, %s1653_s23 }
 0x533   : > { %1219 = vrot.lane.b32.xlu1 %v2059_v30, %s1654_s25 }
 0x535   : > { %1221 = vrot.lane.b32.xlu0 %v2061_v32, %s1654_s25 }
 0x537   : > { %1181 = vrot.lane.b32.xlu1 %v2059_v30, %s1655_s26 }
 0x539   : > { %1183 = vrot.lane.b32.xlu0 %v2061_v32, %s1655_s26 }
 0x53b   : > { %1159 = vrot.lane.b32.xlu1 %v2059_v30, %s1656_s30 }
 0x53d   : > { %1161 = vrot.lane.b32.xlu0 %v2061_v32, %s1656_s30 }
 0x53f   : > { %1137 = vrot.lane.b32.xlu1 %v2059_v30, %s1657_s6 }
 0x541   : > { %1139 = vrot.lane.b32.xlu0 %v2061_v32, %s1657_s6  ;;  %s215_s6 = sand.u32 1, %s1639_s19  }
 0x542   : > { %s1406_s14 = scalar_lea.sflag [#allocation4], %s215_s6 }
 0x543   : > { %1115 = vrot.lane.b32.xlu1 %v2059_v30, %s1658_s7 }
 0x545   : > { %1117 = vrot.lane.b32.xlu0 %v2061_v32, %s1658_s7  ;;  %s1483_s7 = sshll.u32 %s215_s6, 4 }
 0x546   : > { %s217_s9 = scalar_lea.vmem [#allocation3], %s1483_s7 }
 0x547   : > { %1024 = vperm.xlu1 %1586, %v1515_v0   ;;  %s1420_s10 = sshll.u32 %s217_s9, 4  ;;  %s1421_s10 = int_to_ptr.vmem [resolvable:$true] %s1420_s10 }
 0x548   : > { %s1587_s15 = scalar_lea.vmem %s1421_s10, 256  ;;  %p1594_p0 = scmp.lt.s32.totalorder %s1421_s10, %s1592_s16 }
 0x549   : > { %p1588_p11 = scmp.ne.s32.totalorder %s1421_s10, %s1587_s15  ;;  %p1595_p1 = scmp.lt.s32.totalorder %s1593_s17, %s1587_s15 }
 0x54b   : > { %p1589_p12 = pnand %p1588_p11, %p1728_p5  ;;  %p1596_p2 = por %p1595_p1, %p1594_p0 }
 0x54d   : > { %p1590_p13 = pneg %p1589_p12 }
 0x54f   : > { %p1597_p3 = pnand %p1596_p2, %p1590_p13 }
 0x599   : > { %v1286_v34 = vpop.permute.xlu1 %1285 }
 0x59b   : > { %v1288_v38 = vpop.permute.xlu0 %1287 }
 0x59c   : > { %v1289_v39 = vsel %vm513_vm2, %v1286_v34, %v1288_v38  ;;  %v1290_v40 = vsel %vm513_vm2, %v1288_v38, %v1286_v34 }
 0x59d   : > { %v1303_v41 = vmul.f32 %v1296_v35, %v1289_v39  ;;  %v1304_v42 = vmul.f32 %v1300_v36, %v1290_v40  ;;  %v1264_v43 = vpop.permute.xlu1 %1263  ;;  %v1148_v35 = vrot.slane %v1519_v29, %v1809_v24  ;;  %v1152_v36 = vrot.slane %v1519_v29, %v1811_v25 }
 0x59f   : > { %v1266_v47 = vpop.permute.xlu0 %1265  ;;  %1344 = vmatprep.subr.mxu1 %v1304_v42 }
 0x5a0   : > { %v1267_v48 = vsel %vm489_vm1, %v1264_v43, %v1266_v47  ;;  %v1268_v49 = vsel %vm489_vm1, %v1266_v47, %v1264_v43  ;;  %1345 = vmatpush1.msra.mxu1 %v1303_v41  ;;  %v1126_v43 = vrot.slane %v1121_v37, %v1809_v24 }
 0x5a1   : > { %v1281_v50 = vmul.f32 %v1274_v44, %v1267_v48  ;;  %v1282_v51 = vmul.f32 %v1278_v45, %v1268_v49  ;;  %v1242_v53 = vpop.permute.xlu1 %1241  ;;  %v1130_v44 = vrot.slane %v1121_v37, %v1811_v25 }
 0x5a3   : > { %v1244_v52 = vpop.permute.xlu0 %1243  ;;  %1346 = vmatprep.subr.mxu1 %v1282_v51  ;;  %v1527_v51 = vld [vmem:[%s2220_s3 + $0x10] sm:$0xff] }
 0x5a4   : > { %v1245_v57 = vsel %vm465_vm3, %v1242_v53, %v1244_v52  ;;  %v1246_v58 = vsel %vm465_vm3, %v1244_v52, %v1242_v53  ;;  %1347 = vmatpush1.msra.mxu1 %v1281_v50 }
 0x5a5   : > { %v1259_v59 = vmul.f32 %v1252_v54, %v1245_v57  ;;  %v1260_v60 = vmul.f32 %v1256_v55, %v1246_v58  ;;  %v1220_v61 = vpop.permute.xlu1 %1219 }
 0x5a7   : > { %v1222_v3 = vpop.permute.xlu0 %1221  ;;  %1348 = vmatprep.subr.mxu1 %v1260_v60 }
 0x5a8   : > { %v1223_v5 = vsel %vm441_vm4, %v1220_v61, %v1222_v3  ;;  %v1224_v6 = vsel %vm441_vm4, %v1222_v3, %v1220_v61  ;;  %1349 = vmatpush1.msra.mxu1 %v1259_v59 }
 0x5a9   : > { %v1237_v10 = vmul.f32 %v1230_v62, %v1223_v5  ;;  %v1238_v12 = vmul.f32 %v1234_v63, %v1224_v6  ;;  %v1182_v14 = vpop.permute.xlu1 %1181 }
 0x5ab   : > { %v1184_v18 = vpop.permute.xlu0 %1183  ;;  %1350 = vmatprep.subr.mxu1 %v1238_v12 }
 0x5ac   : > { %v1185_v20 = vsel %vm400_vm5, %v1182_v14, %v1184_v18  ;;  %v1186_v13 = vsel %vm400_vm5, %v1184_v18, %v1182_v14  ;;  %1351 = vmatpush1.msra.mxu1 %v1237_v10 }
 0x5ad   : > { %v1199_v23 = vmul.f32 %v1192_v15, %v1186_v13  ;;  %v1200_v26 = vmul.f32 %v1196_v16, %v1185_v20  ;;  %1352 = vmatprep.subr.mxu1 %v1216_v19  ;;  %v1160_v27 = vpop.permute.xlu1 %1159 }
 0x5ae   : > { %1353 = vmatpush1.msra.mxu1 %v1215_v21 }
 0x5af   : > { %v1162_v31 = vpop.permute.xlu0 %1161  ;;  %1354 = vmatprep.subr.mxu1 %v1200_v26 }
 0x5b0   : > { %v1163_v32 = vsel %vm376_vm6, %v1160_v27, %v1162_v31  ;;  %v1164_v30 = vsel %vm376_vm6, %v1162_v31, %v1160_v27  ;;  %1355 = vmatpush1.msra.mxu1 %v1199_v23 }
 0x5b1   : > { %v1177_v0 = vmul.f32 %v1170_v11, %v1164_v30  ;;  %v1178_v33 = vmul.f32 %v1174_v28, %v1163_v32  ;;  %v1138_v34 = vpop.permute.xlu1 %1137 }
 0x5b3   : > { %v1140_v38 = vpop.permute.xlu0 %1139  ;;  %1356 = vmatprep.subr.mxu1 %v1178_v33 }
 0x5b4   : > { %v1141_v39 = vsel %vm352_vm7, %v1138_v34, %v1140_v38  ;;  %v1142_v40 = vsel %vm352_vm7, %v1140_v38, %v1138_v34  ;;  %1357 = vmatpush1.msra.mxu1 %v1177_v0 }
 0x5b5   : > { %v1155_v41 = vmul.f32 %v1148_v35, %v1142_v40  ;;  %v1156_v42 = vmul.f32 %v1152_v36, %v1141_v39  ;;  %v1116_v45 = vpop.permute.xlu1 %1115 }
 0x5b7   : > { %v1118_v46 = vpop.permute.xlu0 %1117  ;;  %1358 = vmatprep.subr.mxu1 %v1156_v42 }
 0x5b8   : > { %v1119_v47 = vsel %vm329_vm8, %v1116_v45, %v1118_v46  ;;  %v1120_v48 = vsel %vm329_vm8, %v1118_v46, %v1116_v45  ;;  %1359 = vmatpush1.msra.mxu1 %v1155_v41 }
 0x5b9   : > { %v1133_v49 = vmul.f32 %v1126_v43, %v1120_v48  ;;  %v1134_v50 = vmul.f32 %v1130_v44, %v1119_v47 }
 0x5bb   : > { %1360 = vmatprep.subr.mxu1 %v1134_v50 }
 0x5bc   : > { %1361 = vmatpush1.msra.mxu1 %v1133_v49 }
 0x5bd   : > { %1528 = vmatmul.mubr.msk.f32.vlgmr.msra.gmra.mxu1 %vm552_vm9, %v1527_v51 }
 0x5c2   : > { %v1025_v24 = vpop.permute.xlu1 %1024 }
 0x5c3   : > { %v1105_v25 = vadd.f32 %v2055_v7, %v1025_v24  ;;  %v1107_v22 = vadd.f32 %v2057_v8, %v1025_v24 }
 0x67d   : > { %v1396_v53 = vpop.f32.mrf.mxu1 }
 0x67e   : > { %v1401_v54 = vadd.f32 %v1396_v53, %v1105_v25 }
 0x67f   : > { %v1398_v55 = vpop.f32.mrf.mxu1 }
 0x680   : > { %1403 = vst [vmem:[%s217_s9] sm:$0xff] %v1401_v54  ;;  %v1402_v56 = vadd.f32 %v1398_v55, %v1107_v22 }
 0x682   : > { %1404 = vst [vmem:[%s217_s9 + $0x8] sm:$0xff] %v1402_v56 }
 0x683   : > { %1600 = shalt.err (!%p1597_p3)
}
 0x684   : > { %s1601_s23 = scalar_lea.hbm %s1418_s13, 256  ;;  %s1605_s30 = scalar_lea.hbm %s2222_s5, 512 }
 0x685   : > { %p1602_p4 = scmp.ne.s32.totalorder %s1418_s13, %s1601_s23  ;;  %p1606_p9 = scmp.lt.s32.totalorder %s1418_s13, %s2222_s5 }
 0x686   : > { %p1607_p10 = scmp.lt.s32.totalorder %s1605_s30, %s1601_s23 }
 0x687   : > { %p1603_p7 = pnand %p1602_p4, %p1728_p5 }
 0x688   : > { %p1608_p11 = por %p1607_p10, %p1606_p9 }
 0x689   : > { %p1604_p8 = pneg %p1603_p7 }
 0x68b   : > { %p1609_p12 = pnand %p1608_p11, %p1604_p8 }
 0x68d   : > { %1612 = shalt.err (!%p1609_p12)
}
 0x68e   : > { %1536 = dma.vmem_to_hbm [thread:$0]  (%p1728_p5), %s1421_s10, 256, %s1418_s13, %s1406_s14  }
 0x68f PF: > { %p1542_p13 = scmp.ge.s32.totalorder %s1647_s21, 2  ;;  %s1432_s8 = sand.u32 1, %s1635_s18  }
 0x690   : > { %s1433_s9 = scalar_lea.sflag [#allocation4], %s1432_s8 }
 0x691   : > { %p1539_p0 = pnand %p1542_p13, %p1732_p6 }
 0x693   : > { %p1540_p1 = pneg %p1539_p0 }
 0x695   : > { %1630 = dma.done.wait (%p1540_p1), %s1433_s9, 256  }
 0x696   : > { %1632 = vsyncadd (%p1540_p1), %s1433_s9, 4294967040  ;;  %p15_p2 = scmp.ge.s32.totalorder %s1715_s24, 4   ;;  %s2225_s18 = smov %s1639_s19 }
 0x697   : > { %s2226_s19 = smov %s1643_s20  ;;  %s2227_s20 = smov %s1726_s27 }
 0x698   : > { %s2228_s21 = smov %s1715_s24  ;;  %17 = sbr.rel (!%p15_p2) target bundleno = 3 (0x3), region = 89 }
 0x69d   :  { %1438 = vsyncpa [#allocation4], 1 }
 0x69e   :  { %1440 = vsyncpa [#allocation4 + $0x1], 1 }

</bundles_post_ra>
